<compile_context>
chip_gen: v6e
topology: v6e:2x2x1
jax: 0.10.0
libtpu: 0.0.40
codegen_flags: <defaults>
</compile_context>

<pallas_src>
import math

import numpy as np
import jax
import jax.numpy as jnp
from jax.experimental import pallas as pl
from jax.experimental.pallas import tpu as pltpu

KERNEL_SIZE = 7
STD = 1.5
PAD_SSIM = KERNEL_SIZE // 2  # 3
C1 = 0.01 ** 2
C2 = 0.03 ** 2


def _gauss_1d(ksize, std):
    c = ksize // 2
    g = [math.exp(-((k - c) ** 2) / (2.0 * std * std)) for k in range(ksize)]
    s = sum(g)
    return [x / s for x in g]


GAUSS_1D = _gauss_1d(KERNEL_SIZE, STD)


def _reflect_index(m, n):
    # torch.nn.ReflectionPad semantics (no edge repeat).
    if m < 0:
        return -m
    if m >= n:
        return 2 * n - 2 - m
    return m


def _gauss_band(n, ksize=KERNEL_SIZE):
    """Banded gaussian-blur matrix with reflect-pad(ksize//2) folded in.

    out[i] = sum_r mat[i, r] * in[r]  ==  7-tap gaussian of reflect-padded `in`.
    """
    g = GAUSS_1D
    c = ksize // 2
    mat = np.zeros((n, n), dtype=np.float32)
    for i in range(n):
        for k in range(ksize):
            mat[i, _reflect_index(i + k - c, n)] += g[k]
    return mat


# ---------------------------------------------------------------------------
# Fused kernel: edges + gaussian-window SSIM + per-image reduction
# ---------------------------------------------------------------------------
def uv_edge_fused_kernel(pred_ref, targ_ref, gv_hbm, gh_hbm, out_ref,
                         gv_vmem, gh_vmem, dma_sems):
    # pred_ref : (1, 2, H, W)  uv map block (auto-pipelined, double-buffered)
    # targ_ref : (1, 3, H, W)  rgb block    (auto-pipelined, double-buffered)
    # gv_hbm   : (H, H)  vertical reflect-folded gaussian band matrix (pl.ANY)
    # gh_hbm   : (W, W)  horizontal band matrix, pre-transposed (pl.ANY)
    # out_ref  : (1, 1, 1)  per-image sum of the similarity map
    # gv_vmem/gh_vmem : single-buffered VMEM scratch for the band matrices
    # dma_sems : DMA semaphores for the two manual copies
    H = pred_ref.shape[2]
    W = pred_ref.shape[3]

    # Start the (small) band-matrix copies now; wait right before the matmuls so
    # they overlap the trig / sobel stage.  Issued every step (megacore-safe).
    cp_gv = pltpu.make_async_copy(gv_hbm, gv_vmem, dma_sems.at[0])
    cp_gh = pltpu.make_async_copy(gh_hbm, gh_vmem, dma_sems.at[1])
    cp_gv.start()
    cp_gh.start()

    uv = pred_ref[0]                      # (2, H, W)
    u = uv[0]
    v = uv[1]
    rgb = targ_ref[0]                     # (3, H, W)

    # ---- trig, computed once and reused (4 EUP transcendentals per pixel) ----
    cu = jnp.cos(u)
    cv = jnp.cos(v)
    su = jnp.sin(u)
    sv = jnp.sin(v)

    p = jnp.abs(cu) * jnp.abs(cv)                                  # (H, W)
    gray = 0.299 * rgb[0] + 0.587 * rgb[1] + 0.114 * rgb[2]        # (H, W)

    # ---- sobel with reflect-pad(1): border response is exactly zero ----
    # Aligned shapes: pltpu.roll (XLU slot) + iota border mask (VPU), no relayouts.
    # Unaligned/small shapes (self-test): proven slice+concat path.
    # The sign of the centered difference is irrelevant (results are squared/abs'd),
    # so the roll wrap direction does not matter.
    aligned = (H % 8 == 0) and (W % 128 == 0)
    if aligned:
        col = jax.lax.broadcasted_iota(jnp.int32, (H, W), 1)
        row = jax.lax.broadcasted_iota(jnp.int32, (H, W), 0)
        col_interior = jnp.logical_and(col > 0, col < W - 1)
        row_interior = jnp.logical_and(row > 0, row < H - 1)

        def sobel_x(a):
            d = pltpu.roll(a, W - 1, axis=1) - pltpu.roll(a, 1, axis=1)
            return jnp.where(col_interior, d, 0.0)

        def sobel_y(a):
            d = pltpu.roll(a, H - 1, axis=0) - pltpu.roll(a, 1, axis=0)
            return jnp.where(row_interior, d, 0.0)
    else:
        zc = jnp.zeros((H, 1), jnp.float32)
        zr = jnp.zeros((1, W), jnp.float32)

        def sobel_x(a):   # a[:, j+1] - a[:, j-1], zero on first/last column
            return jnp.concatenate([zc, a[:, 2:] - a[:, :-2], zc], axis=1)

        def sobel_y(a):   # a[i+1, :] - a[i-1, :], zero on first/last row
            return jnp.concatenate([zr, a[2:, :] - a[:-2, :], zr], axis=0)

    gx = sobel_x(p)
    gy = sobel_y(p)
    pred_edge = jnp.sqrt(gx * gx + gy * gy)

    tgx = jnp.abs(sobel_x(gray))
    tgy = jnp.abs(sobel_y(gray))
    eu = tgx * su * cv
    ev = tgy * cu * sv
    targ_edge = jnp.sqrt(eu * eu + ev * ev)

    # ---- SSIM: separable 7x7 gaussian blur as banded MXU matmuls ----
    x = pred_edge
    y = targ_edge
    # Lane-stack the 5 blur planes -> ONE vertical-pass matmul with a fat N dim.
    stacked = jnp.concatenate([x, y, x * x, y * y, x * y], axis=1)     # (H, 5W)

    cp_gv.wait()
    cp_gh.wait()
    gvm = gv_vmem[...]                                                 # (H, H)
    ghm = gh_vmem[...]                                                 # (W, W)

    vb = jnp.dot(gvm, stacked, preferred_element_type=jnp.float32)     # (H, 5W)

    # 5 horizontal matmuls sharing the SAME RHS (ghm stays weight-stationary).
    mu_x = jnp.dot(vb[:, 0 * W:1 * W], ghm, preferred_element_type=jnp.float32)
    mu_y = jnp.dot(vb[:, 1 * W:2 * W], ghm, preferred_element_type=jnp.float32)
    mu_xx = jnp.dot(vb[:, 2 * W:3 * W], ghm, preferred_element_type=jnp.float32)
    mu_yy = jnp.dot(vb[:, 3 * W:4 * W], ghm, preferred_element_type=jnp.float32)
    mu_xy = jnp.dot(vb[:, 4 * W:5 * W], ghm, preferred_element_type=jnp.float32)

    sigma_x = mu_xx - mu_x * mu_x
    sigma_y = mu_yy - mu_y * mu_y
    sigma_xy = mu_xy - mu_x * mu_y

    num = (2.0 * mu_x * mu_y + C1) * (2.0 * sigma_xy + C2)
    den = (mu_x * mu_x + mu_y * mu_y + C1) * (sigma_x + sigma_y + C2)
    # similarity = (1 - ssim_loss) / 2 = ssim / 2 ; approx reciprocal -> EUP slot.
    sim = 0.5 * num * pl.reciprocal(den, approx=True)                  # (H, W)

    # ---- reduce in-kernel: only a per-image scalar goes back to HBM ----
    row_sum = jnp.sum(sim, axis=1, keepdims=True)                      # (H, 1)
    out_ref[0] = jnp.sum(row_sum, axis=0, keepdims=True)               # (1, 1)


# ---------------------------------------------------------------------------
# Wrapper: UVEdge.forward(pred, target) -> scalar loss
# ---------------------------------------------------------------------------
def uv_edge_loss(pred, target):
    # pred: (B, 2, H, W) float ; target: (B, 3, H, W) float
    B, C, H, W = pred.shape
    assert C == 2 and target.shape == (B, 3, H, W)
    assert H >= 4 and W >= 4  # reflection-pad(3) validity, same constraint as torch
    # Best performance when H % 8 == 0 and W % 128 == 0 (unmasked vregs, aligned
    # lane slices, roll-based sobel path); correctness does not require it.
    pred = pred.astype(jnp.float32)
    target = target.astype(jnp.float32)

    # Reflect-folded gaussian band matrices (trace-time constants).
    gv = jnp.asarray(_gauss_band(H))       # (H, H): vertical pass, left-multiply
    gh = jnp.asarray(_gauss_band(W)).T     # (W, W): horizontal pass, right-multiply

    # Budget scoped VMEM from the block sizes: double-buffered image blocks,
    # single-buffered band-matrix scratch, ~generous allowance for f32 temporaries.
    vmem_limit_bytes = int(min(
        2 * (2 + 3) * H * W * 4        # pred+target blocks, double-buffered
        + (H * H + W * W) * 4          # gv/gh scratch (single-buffered)
        + 64 * H * W * 4               # in-kernel temporaries (trig, edges, vb, mus)
        + (4 << 20),                   # headroom for compiler-internal scratch
        64 << 20))

    per_image_sum = pl.pallas_call(
        uv_edge_fused_kernel,
        out_shape=jax.ShapeDtypeStruct((B, 1, 1), jnp.float32),
        grid=(B,),
        in_specs=[
            pl.BlockSpec((1, 2, H, W), lambda b: (b, 0, 0, 0)),
            pl.BlockSpec((1, 3, H, W), lambda b: (b, 0, 0, 0)),
            pl.BlockSpec(memory_space=pl.ANY),   # gv: manual DMA -> single buffer
            pl.BlockSpec(memory_space=pl.ANY),   # gh: manual DMA -> single buffer
        ],
        out_specs=pl.BlockSpec((1, 1, 1), lambda b: (b, 0, 0)),
        scratch_shapes=[
            pltpu.VMEM((H, H), jnp.float32),
            pltpu.VMEM((W, W), jnp.float32),
            pltpu.SemaphoreType.DMA((2,)),
        ],
        compiler_params=pltpu.CompilerParams(
            dimension_semantics=("parallel",),
            vmem_limit_bytes=vmem_limit_bytes,
        ),
    )(pred, target, gv, gh)

    return jnp.sum(per_image_sum) / (B * H * W)


# ---------------------------------------------------------------------------
# Pure-JAX reference (correctness self-check only)
# ---------------------------------------------------------------------------
def _reference_loss(pred, target):
    B, _, H, W = pred.shape
    pred = pred.astype(jnp.float32)
    target = target.astype(jnp.float32)
    u, v = pred[:, 0], pred[:, 1]
    p = jnp.abs(jnp.cos(u)) * jnp.abs(jnp.cos(v))
    pp = jnp.pad(p, ((0, 0), (1, 1), (1, 1)), mode="reflect")
    gx = pp[:, 1:H + 1, 2:] - pp[:, 1:H + 1, :W]
    gy = pp[:, 2:, 1:W + 1] - pp[:, :H, 1:W + 1]
    pred_edge = jnp.sqrt(gx * gx + gy * gy)

    gray = 0.299 * target[:, 0] + 0.587 * target[:, 1] + 0.114 * target[:, 2]
    gp = jnp.pad(gray, ((0, 0), (1, 1), (1, 1)), mode="reflect")
    tgx = jnp.abs(gp[:, 1:H + 1, 2:] - gp[:, 1:H + 1, :W])
    tgy = jnp.abs(gp[:, 2:, 1:W + 1] - gp[:, :H, 1:W + 1])
    eu = tgx * jnp.sin(u) * jnp.cos(v)
    ev = tgy * jnp.cos(u) * jnp.sin(v)
    targ_edge = jnp.sqrt(eu * eu + ev * ev)

    g1 = jnp.asarray(GAUSS_1D, dtype=jnp.float32)
    win = jnp.outer(g1, g1)

    def blur(x):
        xp = jnp.pad(x, ((0, 0), (PAD_SSIM, PAD_SSIM), (PAD_SSIM, PAD_SSIM)),
                     mode="reflect")
        out = jnp.zeros_like(x)
        for a in range(KERNEL_SIZE):
            for b in range(KERNEL_SIZE):
                out = out + win[a, b] * xp[:, a:a + H, b:b + W]
        return out

    x, y = pred_edge, targ_edge
    mu_x, mu_y = blur(x), blur(y)
    sx = blur(x * x) - mu_x * mu_x
    sy = blur(y * y) - mu_y * mu_y
    sxy = blur(x * y) - mu_x * mu_y
    ssim = ((2 * mu_x * mu_y + C1) * (2 * sxy + C2)) / (
        (mu_x * mu_x + mu_y * mu_y + C1) * (sx + sy + C2))
    return jnp.mean(0.5 * ssim)


if __name__ == "__main__":
    key = jax.random.PRNGKey(0)
    k1, k2 = jax.random.split(key)
    B, H, W = 2, 16, 16
    pred = jax.random.normal(k1, (B, 2, H, W), dtype=jnp.float32)      # uv map
    target = jax.random.uniform(k2, (B, 3, H, W), dtype=jnp.float32)   # rgb image

    loss = jax.jit(uv_edge_loss)(pred, target)
    jax.block_until_ready(loss)
    assert loss.shape == () and loss.dtype == jnp.float32
    assert bool(jnp.isfinite(loss))

    ref = _reference_loss(pred, target)
    assert abs(float(loss) - float(ref)) < 5e-3, (float(loss), float(ref))

    print("KERNEL_OK")
</pallas_src>

<mosaic_0001>
module attributes {stable_mosaic.version = 11 : i64} {
  func.func @uv_edge_fused_kernel(%arg0: i32, %arg1: memref<1x2x16x16xf32, #tpu.memory_space<vmem>>, %arg2: memref<1x3x16x16xf32, #tpu.memory_space<vmem>>, %arg3: memref<16x16xf32, #tpu.memory_space<any>>, %arg4: memref<16x16xf32, #tpu.memory_space<any>>, %arg5: memref<1x1x1xf32, #tpu.memory_space<vmem>>, %arg6: memref<16x16xf32, #tpu.memory_space<vmem>>, %arg7: memref<16x16xf32, #tpu.memory_space<vmem>>, %arg8: memref<2x!tpu.dma_semaphore, #tpu.memory_space<semaphore_mem>>) attributes {dimension_semantics = [#tpu.dimension_semantics<parallel>], iteration_bounds = array<i64: 2>, scalar_prefetch = 0 : i64, scratch_operands = 3 : i64, tpu.core_type = #tpu.core_type<tc>, window_params = [{transform_indices = @transform_0, window_bounds = array<i64: 1, 2, 16, 16>}, {transform_indices = @transform_1, window_bounds = array<i64: 1, 3, 16, 16>}, {}, {}, {transform_indices = @transform_4, window_bounds = array<i64: 1, 1, 1>}]} {
    %c0_i32 = arith.constant 0 : i32
    %0 = tpu.memref_slice %arg8[%c0_i32] : memref<2x!tpu.dma_semaphore, #tpu.memory_space<semaphore_mem>> -> memref<1x!tpu.dma_semaphore, #tpu.memory_space<semaphore_mem>>
    %1 = tpu.memref_squeeze %0 : memref<1x!tpu.dma_semaphore, #tpu.memory_space<semaphore_mem>> -> memref<!tpu.dma_semaphore, #tpu.memory_space<semaphore_mem>>
    tpu.enqueue_dma source(%arg3 : memref<16x16xf32, #tpu.memory_space<any>>) target(%arg6 : memref<16x16xf32, #tpu.memory_space<vmem>>) target_semaphore(%1 : memref<!tpu.dma_semaphore, #tpu.memory_space<semaphore_mem>>)
    %c1_i32 = arith.constant 1 : i32
    %2 = tpu.memref_slice %arg8[%c1_i32] : memref<2x!tpu.dma_semaphore, #tpu.memory_space<semaphore_mem>> -> memref<1x!tpu.dma_semaphore, #tpu.memory_space<semaphore_mem>>
    %3 = tpu.memref_squeeze %2 : memref<1x!tpu.dma_semaphore, #tpu.memory_space<semaphore_mem>> -> memref<!tpu.dma_semaphore, #tpu.memory_space<semaphore_mem>>
    tpu.enqueue_dma source(%arg4 : memref<16x16xf32, #tpu.memory_space<any>>) target(%arg7 : memref<16x16xf32, #tpu.memory_space<vmem>>) target_semaphore(%3 : memref<!tpu.dma_semaphore, #tpu.memory_space<semaphore_mem>>)
    %c0 = arith.constant 0 : index
    %c0_0 = arith.constant 0 : index
    %c0_1 = arith.constant 0 : index
    %c0_2 = arith.constant 0 : index
    %4 = vector.load %arg1[%c0, %c0_0, %c0_1, %c0_2] : memref<1x2x16x16xf32, #tpu.memory_space<vmem>>, vector<1x2x16x16xf32>
    %5 = vector.shape_cast %4 : vector<1x2x16x16xf32> to vector<2x16x16xf32>
    %6 = vector.extract_strided_slice %5 {offsets = [0, 0, 0], sizes = [1, 16, 16], strides = [1, 1, 1]} : vector<2x16x16xf32> to vector<1x16x16xf32>
    %7 = vector.shape_cast %6 : vector<1x16x16xf32> to vector<16x16xf32>
    %8 = vector.extract_strided_slice %5 {offsets = [1, 0, 0], sizes = [1, 16, 16], strides = [1, 1, 1]} : vector<2x16x16xf32> to vector<1x16x16xf32>
    %9 = vector.shape_cast %8 : vector<1x16x16xf32> to vector<16x16xf32>
    %c0_3 = arith.constant 0 : index
    %c0_4 = arith.constant 0 : index
    %c0_5 = arith.constant 0 : index
    %c0_6 = arith.constant 0 : index
    %10 = vector.load %arg2[%c0_3, %c0_4, %c0_5, %c0_6] : memref<1x3x16x16xf32, #tpu.memory_space<vmem>>, vector<1x3x16x16xf32>
    %11 = vector.shape_cast %10 : vector<1x3x16x16xf32> to vector<3x16x16xf32>
    %12 = math.cos %7 : vector<16x16xf32>
    %13 = math.cos %9 : vector<16x16xf32>
    %14 = math.sin %7 : vector<16x16xf32>
    %15 = math.sin %9 : vector<16x16xf32>
    %16 = math.absf %12 : vector<16x16xf32>
    %17 = math.absf %13 : vector<16x16xf32>
    %18 = arith.mulf %16, %17 : vector<16x16xf32>
    %19 = vector.extract_strided_slice %11 {offsets = [0, 0, 0], sizes = [1, 16, 16], strides = [1, 1, 1]} : vector<3x16x16xf32> to vector<1x16x16xf32>
    %20 = vector.shape_cast %19 : vector<1x16x16xf32> to vector<16x16xf32>
    %cst = arith.constant 2.990000e-01 : f32
    %21 = vector.broadcast %cst : f32 to vector<16x16xf32>
    %22 = arith.mulf %21, %20 : vector<16x16xf32>
    %23 = vector.extract_strided_slice %11 {offsets = [1, 0, 0], sizes = [1, 16, 16], strides = [1, 1, 1]} : vector<3x16x16xf32> to vector<1x16x16xf32>
    %24 = vector.shape_cast %23 : vector<1x16x16xf32> to vector<16x16xf32>
    %cst_7 = arith.constant 5.870000e-01 : f32
    %25 = vector.broadcast %cst_7 : f32 to vector<16x16xf32>
    %26 = arith.mulf %25, %24 : vector<16x16xf32>
    %27 = arith.addf %22, %26 : vector<16x16xf32>
    %28 = vector.extract_strided_slice %11 {offsets = [2, 0, 0], sizes = [1, 16, 16], strides = [1, 1, 1]} : vector<3x16x16xf32> to vector<1x16x16xf32>
    %29 = vector.shape_cast %28 : vector<1x16x16xf32> to vector<16x16xf32>
    %cst_8 = arith.constant 1.140000e-01 : f32
    %30 = vector.broadcast %cst_8 : f32 to vector<16x16xf32>
    %31 = arith.mulf %30, %29 : vector<16x16xf32>
    %32 = arith.addf %27, %31 : vector<16x16xf32>
    %cst_9 = arith.constant 0.000000e+00 : f32
    %33 = vector.broadcast %cst_9 : f32 to vector<16x1xf32>
    %cst_10 = arith.constant 0.000000e+00 : f32
    %34 = vector.broadcast %cst_10 : f32 to vector<1x16xf32>
    %35 = vector.extract_strided_slice %18 {offsets = [0, 2], sizes = [16, 14], strides = [1, 1]} : vector<16x16xf32> to vector<16x14xf32>
    %36 = vector.extract_strided_slice %18 {offsets = [0, 0], sizes = [16, 14], strides = [1, 1]} : vector<16x16xf32> to vector<16x14xf32>
    %37 = arith.subf %35, %36 : vector<16x14xf32>
    %38 = tpu.concatenate %33, %37, %33 in 1 : vector<16x1xf32>, vector<16x14xf32>, vector<16x1xf32> -> vector<16x16xf32>
    %39 = vector.extract_strided_slice %18 {offsets = [2, 0], sizes = [14, 16], strides = [1, 1]} : vector<16x16xf32> to vector<14x16xf32>
    %40 = vector.extract_strided_slice %18 {offsets = [0, 0], sizes = [14, 16], strides = [1, 1]} : vector<16x16xf32> to vector<14x16xf32>
    %41 = arith.subf %39, %40 : vector<14x16xf32>
    %42 = tpu.concatenate %34, %41, %34 in 0 : vector<1x16xf32>, vector<14x16xf32>, vector<1x16xf32> -> vector<16x16xf32>
    %43 = arith.mulf %38, %38 : vector<16x16xf32>
    %44 = arith.mulf %42, %42 : vector<16x16xf32>
    %45 = arith.addf %43, %44 : vector<16x16xf32>
    %46 = math.sqrt %45 : vector<16x16xf32>
    %47 = vector.extract_strided_slice %32 {offsets = [0, 2], sizes = [16, 14], strides = [1, 1]} : vector<16x16xf32> to vector<16x14xf32>
    %48 = vector.extract_strided_slice %32 {offsets = [0, 0], sizes = [16, 14], strides = [1, 1]} : vector<16x16xf32> to vector<16x14xf32>
    %49 = arith.subf %47, %48 : vector<16x14xf32>
    %50 = tpu.concatenate %33, %49, %33 in 1 : vector<16x1xf32>, vector<16x14xf32>, vector<16x1xf32> -> vector<16x16xf32>
    %51 = math.absf %50 : vector<16x16xf32>
    %52 = vector.extract_strided_slice %32 {offsets = [2, 0], sizes = [14, 16], strides = [1, 1]} : vector<16x16xf32> to vector<14x16xf32>
    %53 = vector.extract_strided_slice %32 {offsets = [0, 0], sizes = [14, 16], strides = [1, 1]} : vector<16x16xf32> to vector<14x16xf32>
    %54 = arith.subf %52, %53 : vector<14x16xf32>
    %55 = tpu.concatenate %34, %54, %34 in 0 : vector<1x16xf32>, vector<14x16xf32>, vector<1x16xf32> -> vector<16x16xf32>
    %56 = math.absf %55 : vector<16x16xf32>
    %57 = arith.mulf %51, %14 : vector<16x16xf32>
    %58 = arith.mulf %57, %13 : vector<16x16xf32>
    %59 = arith.mulf %56, %12 : vector<16x16xf32>
    %60 = arith.mulf %59, %15 : vector<16x16xf32>
    %61 = arith.mulf %58, %58 : vector<16x16xf32>
    %62 = arith.mulf %60, %60 : vector<16x16xf32>
    %63 = arith.addf %61, %62 : vector<16x16xf32>
    %64 = math.sqrt %63 : vector<16x16xf32>
    %65 = arith.mulf %46, %46 : vector<16x16xf32>
    %66 = arith.mulf %64, %64 : vector<16x16xf32>
    %67 = arith.mulf %46, %64 : vector<16x16xf32>
    %68 = tpu.concatenate %46, %64, %65, %66, %67 in 1 : vector<16x16xf32>, vector<16x16xf32>, vector<16x16xf32>, vector<16x16xf32>, vector<16x16xf32> -> vector<16x80xf32>
    %c0_i32_11 = arith.constant 0 : i32
    %69 = tpu.memref_slice %arg8[%c0_i32_11] : memref<2x!tpu.dma_semaphore, #tpu.memory_space<semaphore_mem>> -> memref<1x!tpu.dma_semaphore, #tpu.memory_space<semaphore_mem>>
    %70 = tpu.memref_squeeze %69 : memref<1x!tpu.dma_semaphore, #tpu.memory_space<semaphore_mem>> -> memref<!tpu.dma_semaphore, #tpu.memory_space<semaphore_mem>>
    tpu.wait_dma2 semaphore(%70 : memref<!tpu.dma_semaphore, #tpu.memory_space<semaphore_mem>>) src(%arg3 : memref<16x16xf32, #tpu.memory_space<any>>) dst(%arg6 : memref<16x16xf32, #tpu.memory_space<vmem>>)
    %c1_i32_12 = arith.constant 1 : i32
    %71 = tpu.memref_slice %arg8[%c1_i32_12] : memref<2x!tpu.dma_semaphore, #tpu.memory_space<semaphore_mem>> -> memref<1x!tpu.dma_semaphore, #tpu.memory_space<semaphore_mem>>
    %72 = tpu.memref_squeeze %71 : memref<1x!tpu.dma_semaphore, #tpu.memory_space<semaphore_mem>> -> memref<!tpu.dma_semaphore, #tpu.memory_space<semaphore_mem>>
    tpu.wait_dma2 semaphore(%72 : memref<!tpu.dma_semaphore, #tpu.memory_space<semaphore_mem>>) src(%arg4 : memref<16x16xf32, #tpu.memory_space<any>>) dst(%arg7 : memref<16x16xf32, #tpu.memory_space<vmem>>)
    %c0_13 = arith.constant 0 : index
    %c0_14 = arith.constant 0 : index
    %73 = vector.load %arg6[%c0_13, %c0_14] : memref<16x16xf32, #tpu.memory_space<vmem>>, vector<16x16xf32>
    %c0_15 = arith.constant 0 : index
    %c0_16 = arith.constant 0 : index
    %74 = vector.load %arg7[%c0_15, %c0_16] : memref<16x16xf32, #tpu.memory_space<vmem>>, vector<16x16xf32>
    %cst_17 = arith.constant dense<0.000000e+00> : vector<16x80xf32>
    %75 = tpu.matmul %73, %68, %cst_17 {dimension_numbers = #tpu.dot_dimension_numbers<[1], [0], [0], [1], [0, 0, 1, 1], [], []>} : vector<16x16xf32>, vector<16x80xf32>, vector<16x80xf32> -> vector<16x80xf32>
    %76 = vector.extract_strided_slice %75 {offsets = [0, 0], sizes = [16, 16], strides = [1, 1]} : vector<16x80xf32> to vector<16x16xf32>
    %cst_18 = arith.constant dense<0.000000e+00> : vector<16x16xf32>
    %77 = tpu.matmul %76, %74, %cst_18 {dimension_numbers = #tpu.dot_dimension_numbers<[1], [0], [0], [1], [0, 0, 1, 1], [], []>} : vector<16x16xf32>, vector<16x16xf32>, vector<16x16xf32> -> vector<16x16xf32>
    %78 = vector.extract_strided_slice %75 {offsets = [0, 16], sizes = [16, 16], strides = [1, 1]} : vector<16x80xf32> to vector<16x16xf32>
    %cst_19 = arith.constant dense<0.000000e+00> : vector<16x16xf32>
    %79 = tpu.matmul %78, %74, %cst_19 {dimension_numbers = #tpu.dot_dimension_numbers<[1], [0], [0], [1], [0, 0, 1, 1], [], []>} : vector<16x16xf32>, vector<16x16xf32>, vector<16x16xf32> -> vector<16x16xf32>
    %80 = vector.extract_strided_slice %75 {offsets = [0, 32], sizes = [16, 16], strides = [1, 1]} : vector<16x80xf32> to vector<16x16xf32>
    %cst_20 = arith.constant dense<0.000000e+00> : vector<16x16xf32>
    %81 = tpu.matmul %80, %74, %cst_20 {dimension_numbers = #tpu.dot_dimension_numbers<[1], [0], [0], [1], [0, 0, 1, 1], [], []>} : vector<16x16xf32>, vector<16x16xf32>, vector<16x16xf32> -> vector<16x16xf32>
    %82 = vector.extract_strided_slice %75 {offsets = [0, 48], sizes = [16, 16], strides = [1, 1]} : vector<16x80xf32> to vector<16x16xf32>
    %cst_21 = arith.constant dense<0.000000e+00> : vector<16x16xf32>
    %83 = tpu.matmul %82, %74, %cst_21 {dimension_numbers = #tpu.dot_dimension_numbers<[1], [0], [0], [1], [0, 0, 1, 1], [], []>} : vector<16x16xf32>, vector<16x16xf32>, vector<16x16xf32> -> vector<16x16xf32>
    %84 = vector.extract_strided_slice %75 {offsets = [0, 64], sizes = [16, 16], strides = [1, 1]} : vector<16x80xf32> to vector<16x16xf32>
    %cst_22 = arith.constant dense<0.000000e+00> : vector<16x16xf32>
    %85 = tpu.matmul %84, %74, %cst_22 {dimension_numbers = #tpu.dot_dimension_numbers<[1], [0], [0], [1], [0, 0, 1, 1], [], []>} : vector<16x16xf32>, vector<16x16xf32>, vector<16x16xf32> -> vector<16x16xf32>
    %86 = arith.mulf %77, %77 : vector<16x16xf32>
    %87 = arith.subf %81, %86 : vector<16x16xf32>
    %88 = arith.mulf %79, %79 : vector<16x16xf32>
    %89 = arith.subf %83, %88 : vector<16x16xf32>
    %90 = arith.mulf %77, %79 : vector<16x16xf32>
    %91 = arith.subf %85, %90 : vector<16x16xf32>
    %cst_23 = arith.constant 2.000000e+00 : f32
    %92 = vector.broadcast %cst_23 : f32 to vector<16x16xf32>
    %93 = arith.mulf %92, %77 : vector<16x16xf32>
    %94 = arith.mulf %93, %79 : vector<16x16xf32>
    %cst_24 = arith.constant 9.99999974E-5 : f32
    %95 = vector.broadcast %cst_24 : f32 to vector<16x16xf32>
    %96 = arith.addf %94, %95 : vector<16x16xf32>
    %cst_25 = arith.constant 2.000000e+00 : f32
    %97 = vector.broadcast %cst_25 : f32 to vector<16x16xf32>
    %98 = arith.mulf %97, %91 : vector<16x16xf32>
    %cst_26 = arith.constant 8.99999984E-4 : f32
    %99 = vector.broadcast %cst_26 : f32 to vector<16x16xf32>
    %100 = arith.addf %98, %99 : vector<16x16xf32>
    %101 = arith.mulf %96, %100 : vector<16x16xf32>
    %102 = arith.mulf %77, %77 : vector<16x16xf32>
    %103 = arith.mulf %79, %79 : vector<16x16xf32>
    %104 = arith.addf %102, %103 : vector<16x16xf32>
    %cst_27 = arith.constant 9.99999974E-5 : f32
    %105 = vector.broadcast %cst_27 : f32 to vector<16x16xf32>
    %106 = arith.addf %104, %105 : vector<16x16xf32>
    %107 = arith.addf %87, %89 : vector<16x16xf32>
    %cst_28 = arith.constant 8.99999984E-4 : f32
    %108 = vector.broadcast %cst_28 : f32 to vector<16x16xf32>
    %109 = arith.addf %107, %108 : vector<16x16xf32>
    %110 = arith.mulf %106, %109 : vector<16x16xf32>
    %cst_29 = arith.constant 5.000000e-01 : f32
    %111 = vector.broadcast %cst_29 : f32 to vector<16x16xf32>
    %112 = arith.mulf %111, %101 : vector<16x16xf32>
    %113 = tpu.reciprocal %110 {approx = true} : vector<16x16xf32> -> vector<16x16xf32>
    %114 = arith.mulf %112, %113 : vector<16x16xf32>
    %cst_30 = arith.constant dense<0.000000e+00> : vector<16xf32>
    %115 = vector.multi_reduction <add>, %114, %cst_30 [1] : vector<16x16xf32> to vector<16xf32>
    %116 = vector.shape_cast %115 : vector<16xf32> to vector<16x1xf32>
    %cst_31 = arith.constant dense<0.000000e+00> : vector<1xf32>
    %117 = vector.multi_reduction <add>, %116, %cst_31 [0] : vector<16x1xf32> to vector<1xf32>
    %118 = vector.shape_cast %117 : vector<1xf32> to vector<1x1xf32>
    %c0_32 = arith.constant 0 : index
    %c0_33 = arith.constant 0 : index
    %c0_34 = arith.constant 0 : index
    %119 = vector.load %arg5[%c0_32, %c0_33, %c0_34] : memref<1x1x1xf32, #tpu.memory_space<vmem>>, vector<1x1x1xf32>
    %120 = vector.shape_cast %119 : vector<1x1x1xf32> to vector<1x1xf32>
    %121 = vector.shape_cast %118 : vector<1x1xf32> to vector<1x1x1xf32>
    tpu.vector_store %arg5[%c0_32, %c0_33, %c0_34], %121 {strides = array<i32>} : memref<1x1x1xf32, #tpu.memory_space<vmem>>, vector<1x1x1xf32>,
    return
  }
  func.func @transform_0(%arg0: i32) -> (i32, i32, i32, i32) {
    %c0_i32 = arith.constant 0 : i32
    %c0_i32_0 = arith.constant 0 : i32
    %c0_i32_1 = arith.constant 0 : i32
    %c0_i32_2 = arith.constant 0 : i32
    return %arg0, %c0_i32, %c0_i32_0, %c0_i32_1 : i32, i32, i32, i32
  }
  func.func @transform_1(%arg0: i32) -> (i32, i32, i32, i32) {
    %c0_i32 = arith.constant 0 : i32
    %c0_i32_0 = arith.constant 0 : i32
    %c0_i32_1 = arith.constant 0 : i32
    %c0_i32_2 = arith.constant 0 : i32
    return %arg0, %c0_i32, %c0_i32_0, %c0_i32_1 : i32, i32, i32, i32
  }
  func.func @transform_4(%arg0: i32) -> (i32, i32, i32) {
    %c0_i32 = arith.constant 0 : i32
    %c0_i32_0 = arith.constant 0 : i32
    %c0_i32_1 = arith.constant 0 : i32
    return %arg0, %c0_i32, %c0_i32_0 : i32, i32, i32
  }
}

</mosaic_0001>

<bundles_post_ra>
// kernel: uv_edge_loss.1
= control target key start
LH: loop header
LB: loop body
LE: loop exit
PB: predicated region body
PF: predicated region fallthrough
CT: control target
= control target key end

     0   :  { %9 = vsyncpa [#allocation6], 0  ;;  %s2945_s0 = inlined_call_operand.hbm [shape: f32[2,2,16,16], index: 0, kind: input, shape index: {}]   ;;  %s2946_s1 = inlined_call_operand.hbm [shape: f32[2,3,16,16], index: 1, kind: input, shape index: {}]   ;;  %s2947_s2 = inlined_call_operand.hbm [shape: f32[16,16], index: 2, kind: input, shape index: {}]   ;;  %s2948_s3 = inlined_call_operand.hbm [shape: f32[16,16], index: 3, kind: input, shape index: {}]   ;;  %s2949_s4 = inlined_call_operand.vmem [shape: f32[2,1,1], index: 4, kind: output, shape index: {}]  }
   0x1   :  { %11 = vsyncpa [#allocation6 + $0x1], 0 }
   0x2   :  { %12 = vsyncpa [#allocation8], 0 }
   0x3   :  { %14 = vsyncpa [#allocation8 + $0x1], 0  ;;  %s2335_s15 = smov 0   ;;  %s2337_s16 = smov 0  }
   0x4   :  { %s2339_s17 = smov 0   ;;  %s2341_s18 = smov 0  }
   0x5 LB: > { %s2354_s19 = sadd.s32 4294967295, %s2287_s18   ;;  %s2357_s20 = sadd.s32 1, %s2287_s18   ;;  %s2287_s18 = sphi %s2341_s18, %s2967_s18   ;;  %s2283_s17 = sphi %s2339_s17, %s2966_s17   ;;  %s2279_s16 = sphi %s2337_s16, %s2965_s16   ;;  %s2275_s15 = sphi %s2335_s15, %s2964_s15  }
   0x6   : > { %s24_s21 = ssub.s32 %s2287_s18, %s2357_s20  ;;  %s27_s22 = sadd.s32 1, %s2283_s17 }
   0x7   : > { %p25_p0 = scmp.eq.s32.totalorder %s24_s21, 0  ;;  %p34_p1 = scmp.ne.s32.totalorder %s2283_s17, %s2279_s16 }
   0x8   : > { %p35_p2 = scmp.eq.s32.totalorder %s2287_s18, 0  ;;  %p40_p3 = scmp.ne.s32.totalorder %s2279_s16, %s2275_s15 }
   0x9   : > { %s2367_s23 = scalar_select %p25_p0, %s2283_s17, %s27_s22  }
   0xa   : > { %p36_p4 = por %p35_p2, %p34_p1  ;;  %p41_p5 = scmp.eq.s32.totalorder %s2354_s19, 0 }
   0xb   : > { %p2069_p6 = scmp.lt.s32.totalorder %s2287_s18, 2  ;;  %s2376_s25 = sand.u32 1, %s2283_s17  }
   0xc   : > { %p2371_p7 = por %p41_p5, %p40_p3  ;;  %s1918_s26 = sshll.u32 %s2376_s25, 5 }
   0xd   : > { %s1972_s27 = sshll.u32 %s2287_s18, 9  ;;  %s120_s5 = scalar_lea.vmem [#allocation5], %s1918_s26 }
   0xe   : > { %s2951_s24 = scalar_select %p2371_p7, 1, 0 }
   0xf   : > { %s2383_s30 = scalar_lea.hbm %s2945_s0, %s1972_s27  ;;  %s127_s6 = sshll.u32 %s120_s5, 4  ;;  %s2385_s6 = int_to_ptr.vmem [resolvable:$true] %s127_s6 }
  0x10   : > { %p2387_p8 = pnand %p2069_p6, %p36_p4  ;;  %s117_s8 = scalar_lea.sflag [#allocation6], %s2376_s25 }
  0x11   : > { %s2149_s9 = scalar_lea.hbm %s2383_s30, 512  ;;  %s2154_s12 = scalar_lea.hbm %s2945_s0, 1024 }
  0x12   : > { %p2150_p10 = scmp.ne.s32.totalorder %s2383_s30, %s2149_s9  ;;  %p2151_p11 = pneg %p2387_p8 }
  0x13   : > { %p2155_p0 = scmp.lt.s32.totalorder %s2383_s30, %s2945_s0  ;;  %p2156_p1 = scmp.lt.s32.totalorder %s2154_s12, %s2149_s9 }
  0x14   : > { %p2152_p12 = pnand %p2151_p11, %p2150_p10 }
  0x15   : > { %p2157_p2 = por %p2156_p1, %p2155_p0 }
  0x16   : > { %p2153_p13 = pneg %p2152_p12 }
  0x18   : > { %p2158_p3 = pnand %p2157_p2, %p2153_p13 }
  0x1a   : > { %2161 = shalt.err (!%p2158_p3)
}
  0x1b   : > { %s2162_s15 = scalar_lea.vmem %s2385_s6, 512  ;;  %s2289_s21 = smov [#allocation5]  }
  0x1c   : > { %p2163_p4 = scmp.ne.s32.totalorder %s2385_s6, %s2162_s15  ;;  %s2167_s22 = sshll.u32 %s2289_s21, 4  ;;  %s2168_s22 = int_to_ptr.vmem [resolvable:$false] %s2167_s22 }
  0x1d   : > { %s2169_s26 = scalar_lea.vmem %s2168_s22, 1024  ;;  %p2170_p10 = scmp.lt.s32.totalorder %s2385_s6, %s2168_s22 }
  0x1e   : > { %p2165_p5 = pnand %p2163_p4, %p2151_p11  ;;  %p2171_p12 = scmp.lt.s32.totalorder %s2169_s26, %s2162_s15 }
  0x20   : > { %p2166_p6 = pneg %p2165_p5  ;;  %p2172_p9 = por %p2171_p12, %p2170_p10 }
  0x22   : > { %p2173_p0 = pnand %p2172_p9, %p2166_p6 }
  0x24   : > { %2176 = shalt.err (!%p2173_p0)
}
  0x25   : > { %s2290_s27 = smov 128   ;;  %s2291_s28 = smov 8  }
  0x26   : > { %2065 = dma.hbm_to_vmem [thread:$0]  (!%p2387_p8), %s2383_s30, 512, %s2385_s6, %s117_s8, %s2290_s27, %s2290_s27, %s2291_s28  }
  0x27   : > { %p156_p9 = scmp.lt.s32.totalorder %s2287_s18, 3  ;;  %s2039_s29 = smul.u32 48, %s2376_s25 }
  0x28   : > { %p2953_p13 = scmp.ge.s32.totalorder %s2287_s18, 1  ;;  %s2040_s9 = smul.u32 768, %s2287_s18 }
  0x29   : > { %s141_s13 = scalar_lea.vmem [#allocation7], %s2039_s29  ;;  %s138_s30 = scalar_lea.sflag [#allocation8], %s2376_s25 }
  0x2a   : > { %p2426_p1 = pnand %p2953_p13, %p156_p9  ;;  %s2434_s12 = scalar_lea.hbm %s2946_s1, %s2040_s9 }
  0x2b   : > { %s148_s14 = sshll.u32 %s141_s13, 4  ;;  %s2177_s6 = scalar_lea.hbm %s2434_s12, 768  ;;  %s2436_s14 = int_to_ptr.vmem [resolvable:$true] %s148_s14 }
  0x2c   : > { %p2178_p2 = scmp.ne.s32.totalorder %s2434_s12, %s2177_s6  ;;  %s2182_s15 = scalar_lea.hbm %s2946_s1, 1536 }
  0x2d   : > { %p2183_p5 = scmp.lt.s32.totalorder %s2434_s12, %s2946_s1  ;;  %p2184_p6 = scmp.lt.s32.totalorder %s2182_s15, %s2177_s6 }
  0x2e   : > { %p2180_p3 = pnand %p2178_p2, %p2151_p11 }
  0x2f   : > { %p2185_p10 = por %p2184_p6, %p2183_p5 }
  0x30   : > { %p2181_p4 = pneg %p2180_p3 }
  0x32   : > { %p2186_p12 = pnand %p2185_p10, %p2181_p4 }
  0x34   : > { %2189 = shalt.err (!%p2186_p12)
}
  0x35   : > { %s2190_s25 = scalar_lea.vmem %s2436_s14, 768  ;;  %s2292_s26 = smov [#allocation7]  }
  0x36   : > { %p2191_p0 = scmp.ne.s32.totalorder %s2436_s14, %s2190_s25  ;;  %s2195_s29 = sshll.u32 %s2292_s26, 4  ;;  %s2196_s29 = int_to_ptr.vmem [resolvable:$false] %s2195_s29 }
  0x37   : > { %s2197_s9 = scalar_lea.vmem %s2196_s29, 1536  ;;  %p2198_p2 = scmp.lt.s32.totalorder %s2436_s14, %s2196_s29 }
  0x38   : > { %p2193_p9 = pnand %p2191_p0, %p2151_p11  ;;  %p2199_p3 = scmp.lt.s32.totalorder %s2197_s9, %s2190_s25 }
  0x3a   : > { %p2194_p13 = pneg %p2193_p9  ;;  %p2200_p7 = por %p2199_p3, %p2198_p2 }
  0x3c   : > { %p2201_p5 = pnand %p2200_p7, %p2194_p13 }
  0x3e   : > { %2204 = shalt.err (!%p2201_p5)
}
  0x3f   : > { %2068 = dma.hbm_to_vmem [thread:$0]  (!%p2387_p8), %s2434_s12, 768, %s2436_s14, %s138_s30, %s2290_s27, %s2290_s27, %s2291_s28  }
  0x40   : > { %160 = sbr.rel (%p2426_p1) target bundleno = 1297 (0x511), region = 28  ;;  %s162_s10 = sand.u32 (!%p2426_p1), 1, %s2279_s16  }
  0x41   : > { %s1923_s11 = sshll.u32 (!%p2426_p1), %s162_s10, 5  ;;  %s163_s13 = scalar_lea.sflag (!%p2426_p1), [#allocation6], %s162_s10 }
  0x42   : > { %s2467_s6 = scalar_lea.vmem (!%p2426_p1), [#allocation5], %s1923_s11  ;;  %p2955_p7 = scmp.ne.s32.totalorder (!%p2426_p1), %s2951_s24, 0 }
  0x45   : > { %2262 = dma.done.wait (%p2955_p7), %s163_s13, 512  }
  0x46   : > { %2264 = vsyncadd (%p2955_p7), %s163_s13, 4294966784  ;;  %s2041_s7 = smul.u32 48, %s162_s10  ;;  %s172_s18 = scalar_lea.sflag [#allocation8], %s162_s10 }
  0x48   : > { %s175_s8 = scalar_lea.vmem [#allocation7], %s2041_s7 }
  0x49   : > { %2266 = dma.done.wait (%p2955_p7), %s172_s18, 768  }
  0x4a   : > { %2268 = vsyncadd (%p2955_p7), %s172_s18, 4294966528  ;;  %v229_v0 = vld [vmem:[%s175_s8] sm:$0xff]  ;;  %v231_v1 = vld [vmem:[%s175_s8 + $0x10] sm:$0xff]  ;;  %s2293_s24 = smov 2   ;;  %v2294_v41 = vmov 683565275  }
  0x4b   : > { %v233_v2 = vld [vmem:[%s175_s8 + $0x20] sm:$0xff]  ;;  %v1069_v3 = vmul.f32 0.299, %v229_v0  ;;  %v1071_v4 = vmul.f32 0.587, %v231_v1  ;;  %v230_v6 = vld [vmem:[%s175_s8 + $0x8] sm:$0xff] }
  0x4c   : > { %v1075_v5 = vmul.f32 0.114, %v233_v2  ;;  %v232_v7 = vld [vmem:[%s175_s8 + $0x18] sm:$0xff]  ;;  %v234_v8 = vld [vmem:[%s175_s8 + $0x28] sm:$0xff]  ;;  %v1070_v10 = vmul.f32 0.299, %v230_v6 }
  0x4d   : > { %v1073_v9 = vadd.f32 %v1071_v4, %v1069_v3  ;;  %v1072_v11 = vmul.f32 0.587, %v232_v7  ;;  %v1076_v12 = vmul.f32 0.114, %v234_v8  ;;  %v2478_v13 = vld [vmem:[%s2467_s6] sm:$0xff]  ;;  %v2483_v16 = vld [vmem:[%s2467_s6 + $0x10] sm:$0xff] }
  0x4e   : > { %v235_v17 = vand.u32 2147483647, %v2478_v13  ;;  %v238_v18 = vand.u32 2139095040, %v2478_v13  ;;  %v441_v19 = vand.u32 2147483647, %v2483_v16  ;;  %v444_v22 = vand.u32 2139095040, %v2483_v16 }
  0x4f   : > { %v2480_v14 = vadd.f32 %v1075_v5, %v1073_v9  ;;  %v1074_v15 = vadd.f32 %v1072_v11, %v1070_v10  ;;  %v2498_v27 = vld [vmem:[%s2467_s6 + $0x8] sm:$0xff]  ;;  %v2295_v43 = vmov 2475754826   ;;  %v2296_v45 = vmov 2131351028   ;;  %s2300_s27 = smov 127  }
  0x50   : > { %v239_v21 = vshrl.u32 %v238_v18, 23  ;;  %v242_v23 = vand.u32 8388607, %v235_v17  ;;  %v448_v24 = vand.u32 8388607, %v441_v19  ;;  %v445_v26 = vshrl.u32 %v444_v22, 23 }
  0x51   : > { %1144 = vrot.lane.b32.xlu0 %v2480_v14, %s2293_s24  ;;  %v2490_v20 = vadd.f32 %v1076_v12, %v1074_v15  ;;  %v341_v32 = vand.u32 2139095040, %v2498_v27  ;;  %v2297_v47 = vmov 2102212464   ;;  %v2298_v49 = vmov 920167782   ;;  %s2301_s28 = smov 16  }
  0x52   : > { %v1924_v25 = vadd.s32 4294967169, %v239_v21  ;;  %v1932_v29 = vadd.s32 4294967169, %v445_v26  ;;  %v243_v30 = vor.u32 8388608, %v242_v23  ;;  %v449_v31 = vor.u32 8388608, %v448_v24  ;;  %s2302_s5 = smov 48   ;;  %s2303_s12 = smov 32  }
  0x53   : > { %v2507_v39 = vshrl.u32 %v341_v32, 23  ;;  %v2299_v57 = vmov 1326507024   ;;  %s2304_s14 = smov 64   ;;  %p199_p8 = scmp.lt.s32.totalorder %s2354_s19, 1 }
  0x54   : > { %v245_v28 = vadd.s32 1, %v1924_v25  ;;  %v451_v33 = vadd.s32 1, %v1932_v29  ;;  %v2503_v37 = vshll.u32 %v243_v30, 8  ;;  %v2505_v38 = vshll.u32 %v449_v31, 8  ;;  %s2305_s30 = smov [#allocation2]   ;;  %s2306_s21 = smov [#allocation3]  }
  0x55   : > { %1146 = vrot.lane.b32.xlu0 %v2490_v20, %s2293_s24  ;;  %s209_s15 = sshll.u32 %s2305_s30, 4  ;;  %s2969_s19 = smov (!%p199_p8, %s2354_s19), 1  ;;  %s210_s15 = int_to_ptr.vmem [resolvable:$true] %s209_s15 }
  0x56   : > { %vm246_vm0 = vcmp.gt.s32.totalorder %v245_v28, 0  ;;  %vm452_vm1 = vcmp.gt.s32.totalorder %v451_v33, 0  ;;  %s221_s22 = sshll.u32 %s2306_s21, 4  ;;  %s201_s29 = scalar_lea.vmem %s2949_s4, %s2969_s19  ;;  %s222_s22 = int_to_ptr.vmem [resolvable:$true] %s221_s22 }
  0x57   : > { %v247_v34 = vsel %vm246_vm0, %v245_v28, 0  ;;  %v453_v51 = vsel %vm452_vm1, %v451_v33, 0  ;;  %s2213_s9 = scalar_lea.vmem %s210_s15, 256  ;;  %p2218_p1 = scmp.lt.s32.totalorder %s210_s15, %s210_s15 }
  0x58   : > { %v248_v35 = vshrl.u32 %v247_v34, 5  ;;  %v249_v36 = vand.u32 31, %v247_v34  ;;  %v454_v0 = vshrl.u32 %v453_v51, 5  ;;  %v455_v1 = vand.u32 31, %v453_v51  ;;  %p2214_p11 = scmp.ne.s32.totalorder %s210_s15, %s2213_s9  ;;  %p2219_p4 = scmp.lt.s32.totalorder %s2213_s9, %s2213_s9 }
  0x5a   : > { %v250_v40 = vsub.s32 32, %v249_v36  ;;  %v252_v42 = vshll.u32 %v2294_v41, %v249_v36  ;;  %v255_v44 = vshll.u32 %v2295_v43, %v249_v36  ;;  %v258_v46 = vshll.u32 %v2296_v45, %v249_v36  ;;  %p2220_p6 = por %p2219_p4, %p2218_p1 }
  0x5b   : > { %v261_v48 = vshll.u32 %v2297_v47, %v249_v36  ;;  %v264_v50 = vshll.u32 %v2298_v49, %v249_v36  ;;  %vm267_vm2 = vcmp.lt.s32.totalorder %v248_v35, 1  ;;  %vm268_vm3 = vcmp.lt.s32.totalorder %v248_v35, 2 }
  0x5c   : > { %v251_v52 = vshrl.u32 %v2294_v41, %v250_v40  ;;  %v253_v53 = vshrl.u32 %v2295_v43, %v250_v40  ;;  %v256_v54 = vshrl.u32 %v2296_v45, %v250_v40  ;;  %v259_v55 = vshrl.u32 %v2297_v47, %v250_v40  ;;  %p2221_p10 = pnand %p2220_p6, %p2214_p11 }
  0x5d   : > { %v262_v56 = vshrl.u32 %v2298_v49, %v250_v40  ;;  %v265_v58 = vshrl.u32 %v2299_v57, %v250_v40  ;;  %vm269_vm4 = vcmp.lt.s32.totalorder %v248_v35, 3  ;;  %vm270_vm5 = vcmp.lt.s32.totalorder %v248_v35, 4 }
  0x5e   : > { %v254_v59 = vor.u32 %v253_v53, %v252_v42  ;;  %v257_v60 = vor.u32 %v256_v54, %v255_v44  ;;  %v260_v61 = vor.u32 %v259_v55, %v258_v46  ;;  %v456_v9 = vsub.s32 32, %v455_v1 }
  0x5f   : > { %v263_v62 = vor.u32 %v262_v56, %v261_v48  ;;  %v266_v63 = vor.u32 %v265_v58, %v264_v50  ;;  %v458_v15 = vshll.u32 %v2294_v41, %v455_v1  ;;  %v461_v30 = vshll.u32 %v2295_v43, %v455_v1 }
  0x60   : > { %v271_v2 = vsel %vm267_vm2, %v251_v52, %v254_v59  ;;  %v272_v3 = vsel %vm270_vm5, %v260_v61, 2102212464  ;;  %v275_v4 = vsel %vm267_vm2, %v254_v59, %v257_v60  ;;  %v279_v5 = vsel %vm267_vm2, %v257_v60, %v260_v61 }
  0x61   : > { %v273_v6 = vsel %vm269_vm4, %v257_v60, %v272_v3  ;;  %v276_v7 = vsel %vm270_vm5, %v263_v62, 920167782  ;;  %v280_v8 = vsel %vm270_vm5, %v266_v63, 1326507024  ;;  %v457_v23 = vshrl.u32 %v2294_v41, %v456_v9 }
  0x62   : > { %v274_v10 = vsel %vm268_vm3, %v271_v2, %v273_v6  ;;  %v277_v11 = vsel %vm269_vm4, %v260_v61, %v276_v7  ;;  %v281_v12 = vsel %vm269_vm4, %v263_v62, %v280_v8  ;;  %v459_v29 = vshrl.u32 %v2295_v43, %v456_v9 }
  0x63   : > { %v278_v18 = vsel %vm268_vm3, %v275_v4, %v277_v11  ;;  %v282_v21 = vsel %vm268_vm3, %v279_v5, %v281_v12  ;;  %v290_v22 = vmul.u32 %v2503_v37, %v274_v10  ;;  %v462_v31 = vshrl.u32 %v2296_v45, %v456_v9 }
  0x64   : > { %v2534_v24 = vmul.u32.u64.low %v2503_v37, %v282_v21  ;;  %v2535_v25 = vmul.u32.u64.high %v2503_v37, %v282_v21, %v2534_v24  ;;  %v2538_v26 = vmul.u32.u64.low %v2503_v37, %v278_v18  ;;  %v2539_v28 = vmul.u32.u64.high %v2503_v37, %v278_v18, %v2538_v26 }
  0x65   : > { %v464_v32 = vshll.u32 %v2296_v45, %v455_v1  ;;  %v465_v33 = vshrl.u32 %v2297_v47, %v456_v9  ;;  %v467_v34 = vshll.u32 %v2297_v47, %v455_v1  ;;  %v468_v35 = vshrl.u32 %v2298_v49, %v456_v9 }
  0x66   : > { %v470_v36 = vshll.u32 %v2298_v49, %v455_v1  ;;  %v460_v40 = vor.u32 %v459_v29, %v458_v15  ;;  %v463_v37 = vor.u32 %v462_v31, %v461_v30  ;;  %v471_v42 = vshrl.u32 %v2299_v57, %v456_v9 }
  0x67   : > { %vm473_vm6 = vcmp.lt.s32.totalorder %v454_v0, 1  ;;  %vm292_vm7 = vc.u32 %v2535_v25, %v2538_v26  ;;  %v293_v44 = vadd.s32 1, %v2539_v28  ;;  %v466_v46 = vor.u32 %v465_v33, %v464_v32 }
  0x68   : > { %v1928_v48 = vadd.s32 4294967169, %v2507_v39  ;;  %v469_v50 = vor.u32 %v468_v35, %v467_v34  ;;  %v472_v51 = vor.u32 %v471_v42, %v470_v36  ;;  %vm474_vm8 = vcmp.lt.s32.totalorder %v454_v0, 2  ;;  %v2585_v35 = vld [vmem:[%s2467_s6 + $0x18] sm:$0xff] }
  0x69   : > { %vm475_vm9 = vcmp.lt.s32.totalorder %v454_v0, 3  ;;  %v294_v52 = vsel %vm292_vm7, %v293_v44, %v2539_v28  ;;  %vm476_vm10 = vcmp.lt.s32.totalorder %v454_v0, 4  ;;  %v477_v53 = vsel %vm473_vm6, %v457_v23, %v460_v40 }
  0x6a   : > { %v481_v54 = vsel %vm473_vm6, %v460_v40, %v463_v37  ;;  %v295_v55 = vadd.s32 %v294_v52, %v290_v22  ;;  %v478_v56 = vsel %vm476_vm10, %v466_v46, 2102212464  ;;  %v482_v58 = vsel %vm476_vm10, %v469_v50, 920167782 }
  0x6b   : > { %v485_v59 = vsel %vm473_vm6, %v463_v37, %v466_v46  ;;  %v479_v60 = vsel %vm475_vm9, %v463_v37, %v478_v56  ;;  %v483_v61 = vsel %vm475_vm9, %v466_v46, %v482_v58  ;;  %v486_v62 = vsel %vm476_vm10, %v472_v51, 1326507024 }
  0x6c   : > { %v348_v39 = vadd.s32 1, %v1928_v48  ;;  %v296_v63 = vadd.s32 536870912, %v295_v55  ;;  %v484_v1 = vsel %vm474_vm8, %v481_v54, %v483_v61  ;;  %v487_v2 = vsel %vm475_vm9, %v469_v50, %v486_v62 }
  0x6d   : > { %v338_v3 = vand.u32 2147483647, %v2498_v27  ;;  %v480_v4 = vsel %vm474_vm8, %v477_v53, %v479_v60  ;;  %v488_v5 = vsel %vm474_vm8, %v485_v59, %v487_v2  ;;  %v291_v54 = vadd.s32 %v2538_v26, %v2535_v25 }
  0x6e   : > { %v2564_v6 = vmul.u32.u64.low %v2505_v38, %v484_v1  ;;  %v2565_v7 = vmul.u32.u64.high %v2505_v38, %v484_v1, %v2564_v6  ;;  %v2568_v8 = vshrl.u32 %v296_v63, 30  ;;  %vm349_vm11 = vcmp.gt.s32.totalorder %v348_v39, 0 }
  0x6f   : > { %v2571_v9 = vmul.u32.u64.low %v2505_v38, %v488_v5  ;;  %v2572_v10 = vmul.u32.u64.high %v2505_v38, %v488_v5, %v2571_v9  ;;  %v350_v11 = vsel %vm349_vm11, %v348_v39, 0  ;;  %v496_v15 = vmul.u32 %v2505_v38, %v480_v4 }
  0x70   : > { %v298_v12 = vshll.u32 %v2568_v8, 30  ;;  %v352_v0 = vand.u32 31, %v350_v11  ;;  %v499_v18 = vadd.s32 1, %v2565_v7  ;;  %v345_v21 = vand.u32 8388607, %v338_v3 }
  0x71   : > { %vm498_vm12 = vc.u32 %v2572_v10, %v2564_v6  ;;  %v351_v32 = vshrl.u32 %v350_v11, 5  ;;  %v547_v58 = vand.u32 2139095040, %v2585_v35  ;;  %vm237_vm2 = vcmp.lt.s32.totalorder %v2478_v13, 0 }
  0x72   : > { %v299_v22 = vsub.s32 %v295_v55, %v298_v12  ;;  %v500_v23 = vsel %vm498_vm12, %v499_v18, %v2565_v7  ;;  %v353_v24 = vsub.s32 32, %v352_v0  ;;  %v346_v30 = vor.u32 8388608, %v345_v21 }
  0x73   : > { %v501_v29 = vadd.s32 %v500_v23, %v496_v15  ;;  %v355_v38 = vshll.u32 %v2294_v41, %v352_v0  ;;  %v358_v33 = vshll.u32 %v2295_v43, %v352_v0  ;;  %v361_v37 = vshll.u32 %v2296_v45, %v352_v0 }
  0x74   : > { %v301_v28 = vsub.s32 0, %v299_v22  ;;  %v356_v36 = vshrl.u32 %v2295_v43, %v353_v24  ;;  %v359_v40 = vshrl.u32 %v2296_v45, %v353_v24  ;;  %v362_v44 = vshrl.u32 %v2297_v47, %v353_v24 }
  0x75   : > { %v502_v34 = vadd.s32 536870912, %v501_v29  ;;  %v364_v46 = vshll.u32 %v2297_v47, %v352_v0  ;;  %v365_v48 = vshrl.u32 %v2298_v49, %v353_v24  ;;  %v367_v51 = vshll.u32 %v2298_v49, %v352_v0 }
  0x76   : > { %v1925_v31 = vmin.u32 %v301_v28, %v299_v22  ;;  %v368_v52 = vshrl.u32 %v2299_v57, %v353_v24  ;;  %v2597_v53 = vshll.u32 %v346_v30, 8  ;;  %v354_v56 = vshrl.u32 %v2294_v41, %v353_v24 }
  0x77   : > { %v2593_v50 = vshrl.u32 %v502_v34, 30  ;;  %v357_v60 = vor.u32 %v356_v36, %v355_v38  ;;  %v360_v61 = vor.u32 %v359_v40, %v358_v33  ;;  %v366_v62 = vor.u32 %v365_v48, %v364_v46 }
  0x78   : > { %v303_v42 = vclz %v1925_v31  ;;  %v363_v39 = vor.u32 %v362_v44, %v361_v37  ;;  %vm370_vm14 = vcmp.lt.s32.totalorder %v351_v32, 1  ;;  %vm373_vm15 = vcmp.lt.s32.totalorder %v351_v32, 4 }
  0x79   : > { %v504_v59 = vshll.u32 %v2593_v50, 30  ;;  %v369_v2 = vor.u32 %v368_v52, %v367_v51  ;;  %vm372_vm0 = vcmp.lt.s32.totalorder %v351_v32, 3  ;;  %vm371_vm1 = vcmp.lt.s32.totalorder %v351_v32, 2 }
  0x7a   : > { %v1926_v55 = vadd.s32 4294967294, %v303_v42  ;;  %v375_v5 = vsel %vm373_vm15, %v363_v39, 2102212464  ;;  %v378_v9 = vsel %vm370_vm14, %v357_v60, %v360_v61  ;;  %v379_v11 = vsel %vm373_vm15, %v366_v62, 920167782 }
  0x7b   : > { %v2604_v1 = vsub.s32 %v501_v29, %v504_v59  ;;  %v380_v0 = vsel %vm372_vm0, %v363_v39, %v379_v11  ;;  %v548_v18 = vshrl.u32 %v547_v58, 23  ;;  %v374_v23 = vsel %vm370_vm14, %v354_v56, %v357_v60 }
  0x7c   : > { %vm1927_vm13 = vcmp.lt.s32.totalorder %v1926_v55, 0  ;;  %v382_v24 = vsel %vm370_vm14, %v360_v61, %v363_v39  ;;  %v381_v30 = vsel %vm371_vm1, %v378_v9, %v380_v0  ;;  %v383_v31 = vsel %vm373_vm15, %v369_v2, 1326507024 }
  0x7d   : > { %v306_v63 = vsel %vm1927_vm13, 0, %v1926_v55  ;;  %v507_v7 = vsub.s32 0, %v2604_v1  ;;  %v384_v33 = vsel %vm372_vm0, %v366_v62, %v383_v31  ;;  %v1936_v52 = vadd.s32 4294967169, %v548_v18 }
  0x7e   : > { %v307_v25 = vsub.s32 32, %v306_v63  ;;  %v308_v26 = vshll.u32 %v299_v22, %v306_v63  ;;  %v311_v4 = vsub.s32 4294967266, %v306_v63  ;;  %v376_v22 = vsel %vm372_vm0, %v360_v61, %v375_v5 }
  0x7f   : > { %v1933_v21 = vmin.u32 %v507_v7, %v2604_v1  ;;  %v2619_v34 = vmul.u32.u64.low %v2597_v53, %v381_v30  ;;  %v2620_v36 = vmul.u32.u64.high %v2597_v53, %v381_v30, %v2619_v34  ;;  %v377_v42 = vsel %vm371_vm1, %v374_v23, %v376_v22 }
  0x80   : > { %v309_v12 = vshrl.u32 %v291_v54, %v307_v25  ;;  %v312_v15 = vadd.s32 127, %v311_v4  ;;  %v385_v44 = vsel %vm371_vm1, %v382_v24, %v384_v33  ;;  %v321_v55 = vsub.s32 4, %v2568_v8 }
  0x81   : > { %v509_v38 = vclz %v1933_v21  ;;  %v2626_v48 = vmul.u32.u64.low %v2597_v53, %v385_v44  ;;  %v2627_v51 = vmul.u32.u64.high %v2597_v53, %v385_v44, %v2626_v48  ;;  %v497_v56 = vadd.s32 %v2564_v6, %v2572_v10 }
  0x82   : > { %v310_v28 = vor.u32 %v309_v12, %v308_v26  ;;  %v313_v29 = vshll.u32 %v312_v15, 23  ;;  %v396_v58 = vadd.s32 1, %v2620_v36  ;;  %v554_v59 = vadd.s32 1, %v1936_v52 }
  0x83   : > { %v1934_v46 = vadd.s32 4294967294, %v509_v38  ;;  %vm2636_vm4 = vcmp.le.f32.partialorder %v235_v17, 0.7853982  ;;  %v393_v62 = vmul.u32 %v2597_v53, %v377_v42  ;;  %v544_v6 = vand.u32 2147483647, %v2585_v35 }
  0x84   : > { %v314_v40 = vor.u32 4788187, %v313_v29  ;;  %v317_v37 = vcvt.s32.f32 %v310_v28  ;;  %v322_v25 = vsel %vm237_vm2, %v321_v55, %v2568_v8  ;;  %vm395_vm5 = vc.u32 %v2627_v51, %v2619_v34 }
  0x85   : > { %vm1935_vm3 = vcmp.lt.s32.totalorder %v1934_v46, 0  ;;  %vm555_vm6 = vcmp.gt.s32.totalorder %v554_v59, 0  ;;  %v397_v4 = vsel %vm395_vm5, %v396_v58, %v2620_v36  ;;  %vm443_vm7 = vcmp.lt.s32.totalorder %v2483_v16, 0 }
  0x86   : > { %v315_v54 = vand.u32 2147483647, %v314_v40  ;;  %v512_v61 = vsel %vm1935_vm3, 0, %v1934_v46  ;;  %v556_v53 = vsel %vm555_vm6, %v554_v59, 0  ;;  %v398_v5 = vadd.s32 %v397_v4, %v393_v62 }
  0x87   : > { %v513_v39 = vsub.s32 32, %v512_v61  ;;  %v514_v63 = vshll.u32 %v2604_v1, %v512_v61  ;;  %v517_v2 = vsub.s32 4294967266, %v512_v61  ;;  %v558_v7 = vand.u32 31, %v556_v53 }
  0x88   : > { %v318_v60 = vmul.f32 %v317_v37, %v315_v54  ;;  %vm2657_vm8 = vcmp.le.f32.partialorder %v441_v19, 0.7853982  ;;  %v551_v15 = vand.u32 8388607, %v544_v6  ;;  %v2665_v0 = vsel %vm2636_vm4, 0, %v322_v25 }
  0x89   : > { %v515_v17 = vshrl.u32 %v497_v56, %v513_v39  ;;  %v518_v26 = vadd.s32 127, %v517_v2  ;;  %v399_v18 = vadd.s32 536870912, %v398_v5  ;;  %v559_v21 = vsub.s32 32, %v558_v7 }
  0x8a   : > { %v319_v10 = vxor.u32 2147483648, %v318_v60  ;;  %v561_v19 = vshll.u32 %v2294_v41, %v558_v7  ;;  %v564_v29 = vshll.u32 %v2295_v43, %v558_v7  ;;  %v552_v38 = vor.u32 8388608, %v551_v15 }
  0x8b   : > { %v516_v11 = vor.u32 %v515_v17, %v514_v63  ;;  %v519_v12 = vshll.u32 %v518_v26, 23  ;;  %v2668_v24 = vshrl.u32 %v399_v18, 30  ;;  %v562_v28 = vshrl.u32 %v2295_v43, %v559_v21 }
  0x8c   : > { %v320_v1 = vsel %vm237_vm2, %v319_v10, %v318_v60  ;;  %v565_v30 = vshrl.u32 %v2296_v45, %v559_v21  ;;  %v557_v33 = vshrl.u32 %v556_v53, 5  ;;  %v570_v36 = vshll.u32 %v2297_v47, %v558_v7 }
  0x8d   : > { %v323_v8 = vsel %vm2636_vm4, %v2478_v13, %v320_v1  ;;  %v520_v23 = vor.u32 4788187, %v519_v12  ;;  %v523_v22 = vcvt.s32.f32 %v516_v11  ;;  %v527_v40 = vsub.s32 4, %v2593_v50 }
  0x8e   : > { %2121 = vcosq.f32 %v323_v8  ;;  %v401_v37 = vshll.u32 %v2668_v24, 30  ;;  %v567_v42 = vshll.u32 %v2296_v45, %v558_v7  ;;  %v568_v44 = vshrl.u32 %v2297_v47, %v559_v21 }
  0x8f   : > { %2123 = vsinq.f32 %v323_v8  ;;  %v521_v31 = vand.u32 2147483647, %v520_v23  ;;  %v2679_v46 = vand.u32 3, %v2665_v0  ;;  %v571_v43 = vshrl.u32 %v2298_v49, %v559_v21 }
  0x90   : > { %v573_v52 = vshll.u32 %v2298_v49, %v558_v7  ;;  %v402_v54 = vsub.s32 %v398_v5, %v401_v37  ;;  %v563_v55 = vor.u32 %v562_v28, %v561_v19  ;;  %v566_v56 = vor.u32 %v565_v30, %v564_v29 }
  0x91   : > { %v524_v48 = vmul.f32 %v523_v22, %v521_v31  ;;  %v574_v58 = vshrl.u32 %v2299_v57, %v559_v21  ;;  %v560_v32 = vshrl.u32 %v2294_v41, %v559_v21  ;;  %v572_v60 = vor.u32 %v571_v43, %v570_v36 }
  0x92   : > { %vm576_vm9 = vcmp.lt.s32.totalorder %v557_v33, 1  ;;  %v528_v45 = vsel %vm443_vm7, %v527_v40, %v2593_v50  ;;  %v404_v47 = vsub.s32 0, %v402_v54  ;;  %v569_v61 = vor.u32 %v568_v44, %v567_v42 }
  0x93   : > { %v525_v59 = vxor.u32 2147483648, %v524_v48  ;;  %v592_v62 = vshll.u32 %v552_v38, 8  ;;  %v575_v39 = vor.u32 %v574_v58, %v573_v52  ;;  %vm578_vm10 = vcmp.lt.s32.totalorder %v557_v33, 3 }
  0x94   : > { %vm579_vm11 = vcmp.lt.s32.totalorder %v557_v33, 4  ;;  %v1929_v41 = vmin.u32 %v404_v47, %v402_v54  ;;  %vm577_vm12 = vcmp.lt.s32.totalorder %v557_v33, 2  ;;  %v584_v63 = vsel %vm576_vm9, %v563_v55, %v566_v56 }
  0x95   : > { %v526_v49 = vsel %vm443_vm7, %v525_v59, %v524_v48  ;;  %v580_v50 = vsel %vm576_vm9, %v560_v32, %v563_v55  ;;  %v581_v2 = vsel %vm579_vm11, %v569_v61, 2102212464  ;;  %v585_v10 = vsel %vm579_vm11, %v572_v60, 920167782 }
  0x96   : > { %v529_v57 = vsel %vm2657_vm8, %v2483_v16, %v526_v49  ;;  %v406_v25 = vclz %v1929_v41  ;;  %v582_v17 = vsel %vm578_vm10, %v566_v56, %v581_v2  ;;  %v586_v26 = vsel %vm578_vm10, %v569_v61, %v585_v10 }
  0x97   : > { %2125 = vcosq.f32 %v529_v57  ;;  %v2703_v53 = vsel %vm2657_vm8, 0, %v528_v45  ;;  %v587_v1 = vsel %vm577_vm12, %v584_v63, %v586_v26  ;;  %v588_v5 = vsel %vm576_vm9, %v566_v56, %v569_v61 }
  0x98   : > { %2127 = vsinq.f32 %v529_v57  ;;  %v589_v7 = vsel %vm579_vm11, %v575_v39, 1326507024  ;;  %v394_v11 = vadd.s32 %v2619_v34, %v2627_v51  ;;  %v1930_v12 = vadd.s32 4294967294, %v406_v25 }
  0x99   : > { %v583_v15 = vsel %vm577_vm12, %v580_v50, %v582_v17  ;;  %v590_v18 = vsel %vm578_vm10, %v572_v60, %v589_v7  ;;  %v2716_v23 = vmul.u32.u64.low %v592_v62, %v587_v1  ;;  %v2717_v22 = vmul.u32.u64.high %v592_v62, %v587_v1, %v2716_v23 }
  0x9a   : > { %v591_v21 = vsel %vm577_vm12, %v588_v5, %v590_v18  ;;  %vm1931_vm13 = vcmp.lt.s32.totalorder %v1930_v12, 0  ;;  %vm330_vm14 = vcmp.eq.s32.totalorder %v2679_v46, 0  ;;  %vm333_vm15 = vcmp.eq.s32.totalorder %v2679_v46, 2 }
  0x9b   : > { %v2699_v4 = vpop.eup %2121  ;;  %v2720_v28 = vmul.u32.u64.low %v592_v62, %v591_v21  ;;  %v2721_v29 = vmul.u32.u64.high %v592_v62, %v591_v21, %v2720_v28  ;;  %v409_v34 = vsel %vm1931_vm13, 0, %v1930_v12  ;;  %vm329_vm0 = vcmp.lt.s32.totalorder %v2679_v46, 2 }
  0x9c   : > { %v2708_v8 = vpop.eup %2123  ;;  %v334_v9 = vxor.u32 2147483648, %v2699_v4  ;;  %v410_v51 = vsub.s32 32, %v409_v34  ;;  %v411_v30 = vshll.u32 %v402_v54, %v409_v34  ;;  %v414_v31 = vsub.s32 4294967266, %v409_v34 }
  0x9d   : > { %v331_v19 = vxor.u32 2147483648, %v2708_v8  ;;  %v534_v38 = vand.u32 3, %v2703_v53  ;;  %v599_v33 = vmul.u32 %v592_v62, %v583_v15  ;;  %v602_v36 = vadd.s32 1, %v2717_v22 }
  0x9e   : > { %v335_v37 = vsel %vm333_vm15, %v334_v9, %v2708_v8  ;;  %v412_v42 = vshrl.u32 %v394_v11, %v410_v51  ;;  %v415_v44 = vadd.s32 127, %v414_v31  ;;  %vm601_vm1 = vc.u32 %v2721_v29, %v2716_v23 }
  0x9f   : > { %v332_v40 = vsel %vm330_vm14, %v2699_v4, %v331_v19  ;;  %v603_v46 = vsel %vm601_vm1, %v602_v36, %v2717_v22  ;;  %vm327_vm2 = vweird.f32 %v2478_v13  ;;  %vm539_vm3 = vcmp.eq.s32.totalorder %v534_v38, 2 }
  0xa0   : > { %v413_v48 = vor.u32 %v412_v42, %v411_v30  ;;  %v416_v43 = vshll.u32 %v415_v44, 23  ;;  %v336_v52 = vsel %vm329_vm0, %v332_v40, %v335_v37  ;;  %v604_v54 = vadd.s32 %v603_v46, %v599_v33 }
  0xa1   : > { %vm535_vm4 = vcmp.lt.s32.totalorder %v534_v38, 2  ;;  %vm536_vm5 = vcmp.eq.s32.totalorder %v534_v38, 0  ;;  %v2744_v60 = vsel %vm327_vm2, nan, %v336_v52  ;;  %vm533_vm6 = vweird.f32 %v2483_v16 }
  0xa2   : > { %v417_v56 = vor.u32 4788187, %v416_v43  ;;  %v605_v32 = vadd.s32 536870912, %v604_v54  ;;  %v420_v61 = vcvt.s32.f32 %v413_v48  ;;  %v1063_v41 = vand.u32 2147483647, %v2744_v60 }
  0xa3   : > { %vm340_vm7 = vcmp.lt.s32.totalorder %v2498_v27, 0  ;;  %vm2770_vm8 = vcmp.le.f32.partialorder %v338_v3, 0.7853982  ;;  %v600_v21 = vadd.s32 %v2716_v23, %v2721_v29  ;;  %v1166_v31 = vrot.slane %v2480_v14, 6 }
  0xa4   : > { %v2737_v55 = vpop.eup %2125  ;;  %v418_v47 = vand.u32 2147483647, %v417_v56  ;;  %v2751_v49 = vshrl.u32 %v605_v32, 30  ;;  %v1167_v38 = vrot.slane %v2490_v20, 6  ;;  %vm1103_vm10 = vcmask 1041408  }
  0xa5   : > { %v2739_v58 = vpop.eup %2127  ;;  %v540_v59 = vxor.u32 2147483648, %v2737_v55  ;;  %v424_v40 = vsub.s32 4, %v2668_v24  ;;  %v1171_v46 = vsub.f32 %v2480_v14, %v1166_v31  ;;  %vm546_vm11 = vcmp.lt.s32.totalorder %v2585_v35, 0 }
  0xa6   : > { %v537_v45 = vxor.u32 2147483648, %v2739_v58  ;;  %v607_v63 = vshll.u32 %v2751_v49, 30  ;;  %v421_v2 = vmul.f32 %v420_v61, %v418_v47  ;;  %v1168_v29 = vsel %vm1103_vm10, %v1166_v31, %v1167_v38 }
  0xa7   : > { %v541_v62 = vsel %vm539_vm3, %v540_v59, %v2739_v58  ;;  %v425_v43 = vsel %vm340_vm7, %v424_v40, %v2668_v24  ;;  %v1172_v52 = vsub.f32 %v2490_v20, %v1168_v29  ;;  %vm2796_vm12 = vcmp.le.f32.partialorder %v544_v6, 0.7853982 }
  0xa8   : > { %v538_v39 = vsel %vm536_vm5, %v2737_v55, %v537_v45  ;;  %v608_v25 = vsub.s32 %v604_v54, %v607_v63  ;;  %v422_v1 = vxor.u32 2147483648, %v421_v2  ;;  %v427_v56 = vsel %vm2770_vm8, 0, %v425_v43 }
  0xa9   : > { %v542_v57 = vsel %vm535_vm4, %v538_v39, %v541_v62  ;;  %v1176_v61 = vrot.slane %v1172_v52, 1  ;;  %vm1113_vm13 = vcmask 1046528   ;;  %vm1119_vm14 = vcmask 1040384  }
  0xaa   : > { %v2760_v50 = vsel %vm533_vm6, nan, %v542_v57  ;;  %v610_v26 = vsub.s32 0, %v608_v25  ;;  %v423_v12 = vsel %vm340_vm7, %v422_v1, %v421_v2  ;;  %v431_v57 = vand.u32 3, %v427_v56 }
  0xab   : > { %v1065_v10 = vand.u32 2147483647, %v2760_v50  ;;  %v426_v18 = vsel %vm2770_vm8, %v2498_v27, %v423_v12  ;;  %vm430_vm3 = vweird.f32 %v2498_v27  ;;  %vm636_vm4 = vweird.f32 %v2585_v35 }
  0xac   : > { %v1937_v5 = vmin.u32 %v610_v26, %v608_v25  ;;  %2129 = vcosq.f32 %v426_v18  ;;  %vm433_vm15 = vcmp.eq.s32.totalorder %v431_v57, 0  ;;  %vm436_vm0 = vcmp.eq.s32.totalorder %v431_v57, 2 }
  0xad   : > { %v2763_v17 = vmul.f32 %v1065_v10, %v1063_v41  ;;  %2131 = vsinq.f32 %v426_v18  ;;  %v630_v41 = vsub.s32 4, %v2751_v49  ;;  %vm432_vm1 = vcmp.lt.s32.totalorder %v431_v57, 2 }
  0xae   : > { %v612_v7 = vclz %v1937_v5  ;;  %v1181_v18 = vsel %vm1113_vm13, %v1176_v61, 0.0  ;;  %v844_v31 = vadd.s32 3, %v427_v56 }
  0xaf   : > { %1081 = vrot.lane.b32.xlu1 %v2763_v17, %s2293_s24 }
  0xb0   : > { %v1938_v15 = vadd.s32 4294967294, %v612_v7  ;;  %v845_v29 = vand.u32 3, %v844_v31 }
  0xb2   : > { %vm1939_vm9 = vcmp.lt.s32.totalorder %v1938_v15, 0 }
  0xb3   : > { %v615_v22 = vsel %vm1939_vm9, 0, %v1938_v15 }
  0xb4   : > { %v616_v28 = vsub.s32 32, %v615_v22  ;;  %v617_v34 = vshll.u32 %v608_v25, %v615_v22  ;;  %v620_v51 = vsub.s32 4294967266, %v615_v22  ;;  %v631_v25 = vsel %vm546_vm11, %v630_v41, %v2751_v49 }
  0xb5   : > { %v633_v7 = vsel %vm2796_vm12, 0, %v631_v25  ;;  %v1183_v22 = vand.u32 2147483647, %v1181_v18 }
  0xb6   : > { %v618_v3 = vshrl.u32 %v600_v21, %v616_v28  ;;  %v621_v30 = vadd.s32 127, %v620_v51  ;;  %v637_v15 = vand.u32 3, %v633_v7  ;;  %v948_v51 = vadd.s32 3, %v2703_v53 }
  0xb7   : > { %v1052_v38 = vadd.s32 3, %v633_v7 }
  0xb8   : > { %v619_v33 = vor.u32 %v618_v3, %v617_v34  ;;  %v622_v36 = vshll.u32 %v621_v30, 23  ;;  %vm638_vm5 = vcmp.lt.s32.totalorder %v637_v15, 2  ;;  %vm642_vm7 = vcmp.eq.s32.totalorder %v637_v15, 2 }
  0xb9   : > { %v2800_v47 = vpop.eup %2129  ;;  %v740_v34 = vadd.s32 3, %v2665_v0  ;;  %vm639_vm8 = vcmp.eq.s32.totalorder %v637_v15, 0  ;;  %v949_v40 = vand.u32 3, %v948_v51 }
  0xba   : > { %v623_v37 = vor.u32 4788187, %v622_v36  ;;  %v626_v23 = vcvt.s32.f32 %v619_v33  ;;  %v2804_v39 = vpop.eup %2131  ;;  %v437_v10 = vxor.u32 2147483648, %v2800_v47 }
  0xbb   : > { %v434_v2 = vxor.u32 2147483648, %v2804_v39  ;;  %v741_v36 = vand.u32 3, %v740_v34 }
  0xbc   : > { %v624_v44 = vand.u32 2147483647, %v623_v37  ;;  %v438_v5 = vsel %vm436_vm0, %v437_v10, %v2804_v39  ;;  %vm951_vm0 = vcmp.eq.s32.totalorder %v949_v40, 0 }
  0xbd   : > { %v435_v1 = vsel %vm433_vm15, %v2800_v47, %v434_v2  ;;  %vm742_vm9 = vcmp.lt.s32.totalorder %v741_v36, 2  ;;  %vm950_vm15 = vcmp.lt.s32.totalorder %v949_v40, 2 }
  0xbe   : > { %v627_v54 = vmul.f32 %v626_v23, %v624_v44  ;;  %v439_v12 = vsel %vm432_vm1, %v435_v1, %v438_v5  ;;  %vm954_vm1 = vcmp.eq.s32.totalorder %v949_v40, 2 }
  0xbf   : > { %v440_v49 = vsel %vm430_vm3, nan, %v439_v12 }
  0xc0   : > { %v628_v24 = vxor.u32 2147483648, %v627_v54  ;;  %v1189_v23 = vmul.f32 %v1183_v22, %v440_v49 }
  0xc2   : > { %v629_v62 = vsel %vm546_vm11, %v628_v24, %v627_v54  ;;  %vm743_vm11 = vcmp.eq.s32.totalorder %v741_v36, 0 }
  0xc3   : > { %v1145_v42 = vpop.permute.xlu0 %1144  ;;  %v632_v6 = vsel %vm2796_vm12, %v2585_v35, %v629_v62  ;;  %vm746_vm12 = vcmp.eq.s32.totalorder %v741_v36, 2  ;;  %v745_v53 = vsel %vm743_vm11, %v2699_v4, %v331_v19  ;;  %v953_v19 = vsel %vm951_vm0, %v2737_v55, %v537_v45 }
  0xc4   : > { %v1150_v48 = vsub.f32 %v2480_v14, %v1145_v42  ;;  %v1175_v14 = vrot.slane %v1171_v46, 1  ;;  %2133 = vcosq.f32 %v632_v6  ;;  %v1053_v42 = vand.u32 3, %v1052_v38 }
  0xc5   : > { %2135 = vsinq.f32 %v632_v6  ;;  %v956_v4 = vsel %vm954_vm1, %v540_v59, %v2739_v58 }
  0xc6   : > { %1154 = vrot.lane.b32.xlu0 %v1150_v48, %s2300_s27  ;;  %v1177_v63 = vsel %vm1113_vm13, %v1175_v14, %v1176_v61  ;;  %v748_v48 = vsel %vm746_vm12, %v334_v9, %v2708_v8  ;;  %v957_v9 = vsel %vm950_vm15, %v953_v19, %v956_v4  ;;  %vm1058_vm11 = vcmp.eq.s32.totalorder %v1053_v42, 2 }
  0xc7   : > { %v1180_v26 = vsel %vm1119_vm14, 0.0, %v1177_v63  ;;  %v749_v46 = vsel %vm742_vm9, %v745_v53, %v748_v48  ;;  %v1147_v8 = vpop.permute.xlu0 %1146  ;;  %v958_v32 = vsel %vm533_vm6, nan, %v957_v9  ;;  %vm1055_vm9 = vcmp.eq.s32.totalorder %v1053_v42, 0 }
  0xc8   : > { %v1182_v11 = vand.u32 2147483647, %v1180_v26  ;;  %v750_v54 = vsel %vm327_vm2, nan, %v749_v46  ;;  %vm1054_vm2 = vcmp.lt.s32.totalorder %v1053_v42, 2  ;;  %v1151_v55 = vsub.f32 %v2490_v20, %v1147_v8 }
  0xc9   : > { %vm1097_vm6 = vcmask 7168   ;;  %vm1100_vm12 = vcmask 121856  }
  0xca   : > { %v1188_v21 = vmul.f32 %v1182_v11, %v2744_v60  ;;  %v1064_v60 = vand.u32 2147483647, %v440_v49 }
  0xcc   : > { %v1190_v14 = vmul.f32 %v1188_v21, %v958_v32 }
  0xd1   : > { %v2134_v28 = vpop.eup %2133 }
  0xd2   : > { %v2136_v3 = vpop.eup %2135  ;;  %v643_v30 = vxor.u32 2147483648, %v2134_v28 }
  0xd3   : > { %v640_v33 = vxor.u32 2147483648, %v2136_v3 }
  0xd4   : > { %v644_v37 = vsel %vm642_vm7, %v643_v30, %v2136_v3  ;;  %vm847_vm7 = vcmp.eq.s32.totalorder %v845_v29, 0  ;;  %v1060_v16 = vsel %vm1058_vm11, %v643_v30, %v2136_v3 }
  0xd5   : > { %v641_v44 = vsel %vm639_vm8, %v2134_v28, %v640_v33  ;;  %vm850_vm8 = vcmp.eq.s32.totalorder %v845_v29, 2  ;;  %v849_v13 = vsel %vm847_vm7, %v2800_v47, %v434_v2  ;;  %v1057_v59 = vsel %vm1055_vm9, %v2134_v28, %v640_v33 }
  0xd6   : > { %v645_v0 = vsel %vm638_vm5, %v641_v44, %v644_v37  ;;  %vm846_vm5 = vcmp.lt.s32.totalorder %v845_v29, 2  ;;  %v852_v24 = vsel %vm850_vm8, %v437_v10, %v2804_v39  ;;  %v1061_v61 = vsel %vm1054_vm2, %v1057_v59, %v1060_v16 }
  0xd7   : > { %v2838_v43 = vsel %vm636_vm4, nan, %v645_v0  ;;  %v853_v45 = vsel %vm846_vm5, %v849_v13, %v852_v24  ;;  %v1062_v47 = vsel %vm636_vm4, nan, %v1061_v61  ;;  %v1194_v2 = vmul.f32 %v1190_v14, %v1190_v14 }
  0xd8   : > { %v1066_v52 = vand.u32 2147483647, %v2838_v43  ;;  %v854_v58 = vsel %vm430_vm3, nan, %v853_v45  ;;  %v1191_v62 = vmul.f32 %v1189_v23, %v1062_v47  ;;  %v1104_v23 = vrot.slane %v2763_v17, 6 }
  0xda   : > { %v2849_v56 = vmul.f32 %v1066_v52, %v1064_v60  ;;  %v1195_v34 = vmul.f32 %v1191_v62, %v1191_v62  ;;  %v1109_v42 = vsub.f32 %v2763_v17, %v1104_v23 }
  0xdc   : > { %1083 = vrot.lane.b32.xlu1 %v2849_v56, %s2293_s24  ;;  %v1105_v37 = vrot.slane %v2849_v56, 6  ;;  %v1114_v0 = vrot.slane %v1109_v42, 1 }
  0xde   : > { %v1106_v29 = vsel %vm1103_vm10, %v1104_v23, %v1105_v37 }
  0xdf   : > { %v1110_v44 = vsub.f32 %v2849_v56, %v1106_v29 }
  0xe0   : > { %1156 = vrot.lane.b32.xlu1 %v1151_v55, %s2300_s27 }
  0xe1   : > { %v1115_v53 = vrot.slane %v1110_v44, 1 }
  0xe3   : > { %v1116_v48 = vsel %vm1113_vm13, %v1114_v0, %v1115_v53  ;;  %v1121_v45 = vsel %vm1113_vm13, %v1115_v53, 0.0 }
  0xe4   : > { %v1125_v59 = vmul.f32 %v1121_v45, %v1121_v45 }
 0x121   : > { %v1082_v39 = vpop.permute.xlu1 %1081 }
 0x122   : > { %v1087_v57 = vsub.f32 %v2763_v17, %v1082_v39 }
 0x124   : > { %1091 = vrot.lane.b32.xlu0 %v1087_v57, %s2300_s27 }
 0x138   : > { %v1155_v20 = vpop.permute.xlu0 %1154 }
 0x139   : > { %v1160_v27 = vsel %vm1097_vm6, 0.0, %v1155_v20 }
 0x13a   : > { %v1162_v41 = vsel %vm1100_vm12, %v1160_v27, 0.0 }
 0x13b   : > { %v1164_v6 = vand.u32 2147483647, %v1162_v41 }
 0x13d   : > { %v1184_v63 = vmul.f32 %v1164_v6, %v750_v54 }
 0x13f   : > { %v1186_v35 = vmul.f32 %v1184_v63, %v2760_v50 }
 0x141   : > { %v1192_v10 = vmul.f32 %v1186_v35, %v1186_v35 }
 0x143   : > { %v1196_v25 = vadd.f32 %v1194_v2, %v1192_v10 }
 0x145   : > { %2137 = vrsqrt.f32 %v1196_v25  ;;  %vm1200_vm3 = vcmp.eq.f32.partialorder %v1196_v25, inf  ;;  %v1203_v1 = vand.u32 2147483648, %v1196_v25  ;;  %vm1202_vm4 = vcmp.eq.f32.partialorder %v1196_v25, 0.0 }
 0x14e   : > { %v1084_v11 = vpop.permute.xlu1 %1083 }
 0x14f   : > { %v1088_v15 = vsub.f32 %v2849_v56, %v1084_v11 }
 0x151   : > { %1093 = vrot.lane.b32.xlu1 %v1088_v15, %s2300_s27 }
 0x152   : > { %v2138_v26 = vpop.eup %2137  ;;  %v1157_v50 = vpop.permute.xlu1 %1156 }
 0x153   : > { %v1199_v5 = vmul.f32 %v2138_v26, %v1196_v25  ;;  %v1161_v21 = vsel %vm1097_vm6, 0.0, %v1157_v50 }
 0x154   : > { %v1163_v49 = vsel %vm1100_vm12, %v1161_v21, 0.0 }
 0x155   : > { %v1201_v7 = vsel %vm1200_vm3, %v1196_v25, %v1199_v5  ;;  %v1165_v22 = vand.u32 2147483647, %v1163_v49 }
 0x156   : > { %v1204_v12 = vsel %vm1202_vm4, %v1203_v1, %v1201_v7 }
 0x157   : > { %1220 = vrot.lane.b32.xlu0 %v1204_v12, %s2301_s28  ;;  %v1214_v18 = vmul.f32 %v1204_v12, %v1204_v12  ;;  %v1185_v28 = vmul.f32 %v1165_v22, %v854_v58 }
 0x159   : > { %v1187_v51 = vmul.f32 %v1185_v28, %v2838_v43  ;;  %v1120_v43 = vsel %vm1119_vm14, 0.0, %v1116_v48 }
 0x15a   : > { %v1124_v54 = vmul.f32 %v1120_v43, %v1120_v43 }
 0x15b   : > { %1236 = vrot.lane.b32.xlu0 %v1214_v18, %s2302_s5  ;;  %v1193_v3 = vmul.f32 %v1187_v51, %v1187_v51 }
 0x15d   : > { %v1197_v30 = vadd.f32 %v1195_v34, %v1193_v3 }
 0x15f   : > { %2139 = vrsqrt.f32 %v1197_v30  ;;  %vm1207_vm15 = vcmp.eq.f32.partialorder %v1197_v30, inf  ;;  %v1210_v38 = vand.u32 2147483648, %v1197_v30  ;;  %vm1209_vm0 = vcmp.eq.f32.partialorder %v1197_v30, 0.0 }
 0x16c   : > { %v2140_v31 = vpop.eup %2139 }
 0x16d   : > { %v1206_v33 = vmul.f32 %v2140_v31, %v1197_v30 }
 0x16f   : > { %v1208_v60 = vsel %vm1207_vm15, %v1197_v30, %v1206_v33 }
 0x170   : > { %v2873_v36 = vsel %vm1209_vm0, %v1210_v38, %v1208_v60 }
 0x171   : > { %1222 = vrot.lane.b32.xlu1 %v2873_v36, %s2301_s28  ;;  %v1215_v40 = vmul.f32 %v2873_v36, %v2873_v36 }
 0x175   : > { %1238 = vrot.lane.b32.xlu1 %v1215_v40, %s2302_s5 }
 0x196   : > { %v1092_v46 = vpop.permute.xlu0 %1091 }
 0x197   : > { %v1098_v52 = vsel %vm1097_vm6, 0.0, %v1092_v46 }
 0x198   : > { %v1101_v19 = vsel %vm1100_vm12, %v1098_v52, 0.0 }
 0x199   : > { %v1122_v4 = vmul.f32 %v1101_v19, %v1101_v19 }
 0x19b   : > { %v1126_v8 = vadd.f32 %v1124_v54, %v1122_v4 }
 0x19d   : > { %2141 = vrsqrt.f32 %v1126_v8  ;;  %vm1130_vm10 = vcmp.eq.f32.partialorder %v1126_v8, inf  ;;  %v1133_v17 = vand.u32 2147483648, %v1126_v8  ;;  %vm1132_vm1 = vcmp.eq.f32.partialorder %v1126_v8, 0.0 }
 0x1aa   : > { %v2142_v9 = vpop.eup %2141 }
 0x1ab   : > { %v1129_v32 = vmul.f32 %v2142_v9, %v1126_v8 }
 0x1ad   : > { %v1131_v56 = vsel %vm1130_vm10, %v1126_v8, %v1129_v32 }
 0x1ae   : > { %v1134_v13 = vsel %vm1132_vm1, %v1133_v17, %v1131_v56 }
 0x1af   : > { %v1212_v24 = vmul.f32 %v1134_v13, %v1134_v13  ;;  %v1216_v14 = vmul.f32 %v1204_v12, %v1134_v13 }
 0x1b1   : > { %1228 = vrot.lane.b32.xlu0 %v1212_v24, %s2303_s12 }
 0x1b5   : > { %1244 = vrot.lane.b32.xlu0 %v1216_v14, %s2304_s14 }
 0x1c3   : > { %v1094_v55 = vpop.permute.xlu1 %1093 }
 0x1c4   : > { %v1099_v58 = vsel %vm1097_vm6, 0.0, %v1094_v55 }
 0x1c5   : > { %v1102_v16 = vsel %vm1100_vm12, %v1099_v58, 0.0 }
 0x1c6   : > { %v1123_v61 = vmul.f32 %v1102_v16, %v1102_v16 }
 0x1c8   : > { %v1127_v47 = vadd.f32 %v1125_v59, %v1123_v61 }
 0x1ca   : > { %2143 = vrsqrt.f32 %v1127_v47 }
 0x1cb   : > { %2224 = shalt.err (!%p2221_p10)  }
 0x1cc   : > { %212 = dma.hbm_to_vmem [thread:$0]  %s2947_s2, 256, %s210_s15, [#allocation4] }
 0x1cd   : > { %s2233_s13 = scalar_lea.vmem %s222_s22, 256  ;;  %p2238_p0 = scmp.lt.s32.totalorder %s222_s22, %s222_s22 }
 0x1ce   : > { %p2234_p12 = scmp.ne.s32.totalorder %s222_s22, %s2233_s13  ;;  %p2239_p9 = scmp.lt.s32.totalorder %s2233_s13, %s2233_s13 }
 0x1d0   : > { %p2240_p13 = por %p2239_p9, %p2238_p0 }
 0x1d2   : > { %p2241_p2 = pnand %p2240_p13, %p2234_p12 }
 0x1d7   : > { %v2144_v62 = vpop.eup %2143 }
 0x1d8   : > { %2244 = shalt.err (!%p2241_p2)  }
 0x1d9   : > { %224 = dma.hbm_to_vmem [thread:$0]  %s2948_s3, 256, %s222_s22, [#allocation4 + $0x1]  ;;  %v1136_v39 = vmul.f32 %v2144_v62, %v1127_v47  ;;  %vm1137_vm13 = vcmp.eq.f32.partialorder %v1127_v47, inf  ;;  %v1140_v57 = vand.u32 2147483648, %v1127_v47  ;;  %vm1139_vm14 = vcmp.eq.f32.partialorder %v1127_v47, 0.0  ;;  %v1221_v63 = vpop.permute.xlu0 %1220 }
 0x1da   : > { %vm1250_vm5 = vcmask 130048   ;;  %vm1253_vm7 = vcmask 261120   ;;  %vm1256_vm8 = vcmask 392192   ;;  %vm1259_vm2 = vcmask 523264  }
 0x1db   : > { %v1138_v20 = vsel %vm1137_vm13, %v1127_v47, %v1136_v39  ;;  %v1251_v2 = vsel %vm1250_vm5, %v1134_v13, %v1221_v63 }
 0x1dc   : > { %v1141_v27 = vsel %vm1139_vm14, %v1140_v57, %v1138_v20 }
 0x1dd   : > { %v1213_v41 = vmul.f32 %v1141_v27, %v1141_v27  ;;  %v1217_v6 = vmul.f32 %v2873_v36, %v1141_v27  ;;  %v1237_v35 = vpop.permute.xlu0 %1236 }
 0x1df   : > { %1230 = vrot.lane.b32.xlu1 %v1213_v41, %s2303_s12 }
 0x1e3   : > { %1246 = vrot.lane.b32.xlu1 %v1217_v6, %s2304_s14  ;;  %v1223_v7 = vpop.permute.xlu1 %1222 }
 0x1e4   : > { %v1252_v12 = vsel %vm1250_vm5, %v1141_v27, %v1223_v7 }
 0x1e7   : > { %v1239_v11 = vpop.permute.xlu1 %1238 }
 0x223   : > { %v1229_v10 = vpop.permute.xlu0 %1228 }
 0x224   : > { %v1254_v25 = vsel %vm1253_vm7, %v1251_v2, %v1229_v10 }
 0x225   : > { %v1257_v26 = vsel %vm1256_vm8, %v1254_v25, %v1237_v35 }
 0x227   : > { %v1245_v1 = vpop.permute.xlu0 %1244 }
 0x228   : > { %v1260_v5 = vsel %vm1259_vm2, %v1257_v26, %v1245_v1 }
 0x251   : > { %v1231_v15 = vpop.permute.xlu1 %1230 }
 0x252   : > { %v1255_v18 = vsel %vm1253_vm7, %v1252_v12, %v1231_v15 }
 0x253   : > { %v1258_v50 = vsel %vm1256_vm8, %v1255_v18, %v1239_v11 }
 0x255   : > { %v1247_v21 = vpop.permute.xlu1 %1246 }
 0x256   : > { %v1261_v49 = vsel %vm1259_vm2, %v1258_v50, %v1247_v21 }
 0x257   : > { %2269 = dma.done.wait [#allocation4], 256 }
 0x258   : > { %2270 = vsyncadd [#allocation4], 4294967040 }
 0x259   : > { %2271 = dma.done.wait [#allocation4 + $0x1], 256 }
 0x25a   : > { %2272 = vsyncadd [#allocation4 + $0x1], 4294967040  ;;  %1997 = vmatprep.subr.mxu0 %v1261_v49  ;;  %v1267_v22 = vld [vmem:[#allocation2] sm:$0xff]  ;;  %v1268_v28 = vld [vmem:[#allocation2 + $0x8] sm:$0xff]  ;;  %s2307_s18 = smov 96   ;;  %s2308_s8 = smov 112  }
 0x25b   : > { %1998 = vmatpush3.msra.mxu0 %v1261_v49  ;;  %2001 = vmatprep.mubr.msk.f32.mxu0 %vm1250_vm5, %v1267_v22  ;;  %v1270_v34 = vld [vmem:[#allocation3 + $0x8] sm:$0xff]  ;;  %v1269_v51 = vld [vmem:[#allocation3] sm:$0xff]  ;;  %s2309_s24 = smov 80   ;;  %vm1818_vm9 = vcmask 0  }
 0x25c   : > { %1999 = vmatprep.subr.mxu0 %v1260_v5  ;;  %2004 = vmatprep.subr.mxu1 %v1270_v34 }
 0x25d   : > { %2000 = vmatpush3.msra.mxu0 %v1260_v5  ;;  %2005 = vmatpush3.msra.mxu1 %v1270_v34 }
 0x25e   : > { %2002 = vmatmul.mubr.msk.f32.vlgmr.msra.gmra.mxu0 %vm1250_vm5, %v1268_v28  ;;  %2011 = vmatprep.subr.mxu0 %v1270_v34 }
 0x25f   : > { %2012 = vmatpush3.msra.mxu0 %v1270_v34  ;;  %2006 = vmatprep.subr.mxu1 %v1269_v51 }
 0x260   : > { %2013 = vmatprep.subr.mxu0 %v1269_v51  ;;  %2007 = vmatpush3.msra.mxu1 %v1269_v51 }
 0x261   : > { %2014 = vmatpush3.msra.mxu0 %v1269_v51  ;;  %2018 = vmatprep.subr.mxu1 %v1270_v34 }
 0x262   : > { %2025 = vmatprep.subr.mxu0 %v1270_v34 }
 0x31e   : > { %v2003_v3 = vpop.f32.mrf.mxu0 }
 0x320   : > { %v1343_v30 = vpop.f32.mrf.mxu0 }
 0x321   : > { %1516 = vrot.lane.b32.xlu1 %v1343_v30, %s2307_s18  ;;  %1433 = vrot.lane.b32.xlu0 %v1343_v30, %s2308_s8 }
 0x322   : > { %2008 = vmatprep.mubr.msk.f32.mxu1 %vm1250_vm5, %v1343_v30 }
 0x323   : > { %2009 = vmatmul.mubr.msk.f32.vlgmr.msra.gmra.mxu1 %vm1250_vm5, %v2003_v3 }
 0x324   : > { %2019 = vmatpush3.msra.mxu1 %v1270_v34 }
 0x325   : > { %1599 = vrot.lane.b32.xlu1 %v1343_v30, %s2309_s24  ;;  %1435 = vrot.lane.b32.xlu0 %v2003_v3, %s2308_s8 }
 0x326   : > { %2020 = vmatprep.subr.mxu1 %v1269_v51 }
 0x327   : > { %2021 = vmatpush3.msra.mxu1 %v1269_v51 }
 0x328   : > { %2032 = vmatprep.subr.mxu1 %v1270_v34 }
 0x329   : > { %1601 = vrot.lane.b32.xlu1 %v2003_v3, %s2309_s24  ;;  %1518 = vrot.lane.b32.xlu0 %v2003_v3, %s2307_s18 }
 0x32d   : > { %1684 = vrot.lane.b32.xlu1 %v2003_v3, %s2304_s14  ;;  %1682 = vrot.lane.b32.xlu0 %v1343_v30, %s2304_s14 }
 0x393   : > { %v1517_v31 = vpop.permute.xlu1 %1516  ;;  %v1434_v38 = vpop.permute.xlu0 %1433 }
 0x394   : > { %2015 = vmatprep.mubr.msk.f32.mxu0 %vm1250_vm5, %v1434_v38  ;;  %2022 = vmatprep.mubr.msk.f32.mxu1 %vm1250_vm5, %v1517_v31 }
 0x397   : > { %v1600_v33 = vpop.permute.xlu1 %1599  ;;  %v1436_v60 = vpop.permute.xlu0 %1435 }
 0x398   : > { %2016 = vmatmul.mubr.msk.f32.vlgmr.msra.gmra.mxu0 %vm1250_vm5, %v1436_v60 }
 0x399   : > { %2026 = vmatpush3.msra.mxu0 %v1270_v34  ;;  %2029 = vmatprep.mubr.msk.f32.mxu0 %vm1250_vm5, %v1600_v33 }
 0x39a   : > { %2027 = vmatprep.subr.mxu0 %v1269_v51 }
 0x39b   : > { %2028 = vmatpush3.msra.mxu0 %v1269_v51  ;;  %v1602_v36 = vpop.permute.xlu1 %1601  ;;  %v1519_v40 = vpop.permute.xlu0 %1518 }
 0x39c   : > { %2023 = vmatmul.mubr.msk.f32.vlgmr.msra.gmra.mxu1 %vm1250_vm5, %v1519_v40  ;;  %2030 = vmatmul.mubr.msk.f32.vlgmr.msra.gmra.mxu0 %vm1250_vm5, %v1602_v36 }
 0x39d   : > { %2033 = vmatpush3.msra.mxu1 %v1270_v34 }
 0x39e   : > { %2034 = vmatprep.subr.mxu1 %v1269_v51 }
 0x39f   : > { %v1685_v37 = vpop.permute.xlu1 %1684  ;;  %v1683_v23 = vpop.permute.xlu0 %1682  ;;  %2035 = vmatpush3.msra.mxu1 %v1269_v51 }
 0x3a0   : > { %2036 = vmatprep.mubr.msk.f32.mxu1 %vm1250_vm5, %v1683_v23 }
 0x3a1   : > { %2037 = vmatmul.mubr.msk.f32.vlgmr.msra.gmra.mxu1 %vm1250_vm5, %v1685_v37 }
 0x3e3   : > { %v2010_v29 = vpop.f32.mrf.mxu1 }
 0x3e4   : > { %v1766_v48 = vmul.f32 %v2010_v29, %v2010_v29  ;;  %v1778_v27 = vmul.f32 2.0, %v2010_v29 }
 0x3e5   : > { %v1424_v0 = vpop.f32.mrf.mxu1 }
 0x3e6   : > { %v1765_v8 = vmul.f32 %v1424_v0, %v1424_v0  ;;  %v1777_v63 = vmul.f32 2.0, %v1424_v0 }
 0x458   : > { %v2017_v42 = vpop.f32.mrf.mxu0 }
 0x459   : > { %v1770_v44 = vmul.f32 %v2017_v42, %v2017_v42  ;;  %v1774_v14 = vmul.f32 %v2017_v42, %v2010_v29  ;;  %v1780_v35 = vmul.f32 %v2017_v42, %v1778_v27 }
 0x45a   : > { %v1507_v53 = vpop.f32.mrf.mxu0 }
 0x45b   : > { %v1769_v43 = vmul.f32 %v1507_v53, %v1507_v53  ;;  %v1790_v4 = vadd.f32 %v1770_v44, %v1766_v48  ;;  %v1773_v61 = vmul.f32 %v1507_v53, %v1424_v0  ;;  %v1779_v10 = vmul.f32 %v1777_v63, %v1507_v53 }
 0x45c   : > { %v2024_v46 = vpop.f32.mrf.mxu1  ;;  %v2031_v52 = vpop.f32.mrf.mxu0  ;;  %v1782_v26 = vadd.f32 0.0001, %v1780_v35 }
 0x45d   : > { %v1768_v54 = vsub.f32 %v2024_v46, %v1766_v48  ;;  %v1772_v19 = vsub.f32 %v2031_v52, %v1770_v44  ;;  %v1789_v24 = vadd.f32 %v1769_v43, %v1765_v8  ;;  %v1792_v45 = vadd.f32 0.0001, %v1790_v4 }
 0x45e   : > { %v1590_v9 = vpop.f32.mrf.mxu1  ;;  %v1673_v32 = vpop.f32.mrf.mxu0  ;;  %v1781_v5 = vadd.f32 0.0001, %v1779_v10 }
 0x45f   : > { %v1794_v17 = vadd.f32 %v1772_v19, %v1768_v54  ;;  %v1767_v56 = vsub.f32 %v1590_v9, %v1765_v8  ;;  %v1771_v13 = vsub.f32 %v1673_v32, %v1769_v43  ;;  %v1791_v62 = vadd.f32 0.0001, %v1789_v24 }
 0x461   : > { %v1796_v55 = vadd.f32 0.0009, %v1794_v17  ;;  %v1793_v58 = vadd.f32 %v1771_v13, %v1767_v56  ;;  %v2038_v59 = vpop.f32.mrf.mxu1 }
 0x462   : > { %v1776_v16 = vsub.f32 %v2038_v59, %v1774_v14 }
 0x463   : > { %v1798_v47 = vmul.f32 %v1796_v55, %v1792_v45  ;;  %v1795_v39 = vadd.f32 0.0009, %v1793_v58  ;;  %v1756_v57 = vpop.f32.mrf.mxu1 }
 0x464   : > { %v1775_v20 = vsub.f32 %v1756_v57, %v1773_v61  ;;  %v1784_v6 = vmul.f32 2.0, %v1776_v16 }
 0x465   : > { %2145 = vrcp.f32 %v1798_v47  ;;  %v1797_v41 = vmul.f32 %v1795_v39, %v1791_v62 }
 0x466   : > { %v1783_v2 = vmul.f32 2.0, %v1775_v20  ;;  %v1786_v25 = vadd.f32 0.0009, %v1784_v6 }
 0x467   : > { %2147 = vrcp.f32 %v1797_v41 }
 0x468   : > { %v1785_v1 = vadd.f32 0.0009, %v1783_v2  ;;  %v1788_v7 = vmul.f32 %v1786_v25, %v1782_v26 }
 0x46a   : > { %v1787_v11 = vmul.f32 %v1785_v1, %v1781_v5  ;;  %v1800_v12 = vmul.f32 0.5, %v1788_v7 }
 0x46c   : > { %v1799_v50 = vmul.f32 0.5, %v1787_v11 }
 0x472   : > { %v2146_v15 = vpop.eup %2145 }
 0x473   : > { %v1804_v18 = vmul.f32 %v2146_v15, %v1800_v12 }
 0x474   : > { %v2148_v21 = vpop.eup %2147 }
 0x475   : > { %v1808_v49 = vsel %vm1250_vm5, %v1804_v18, 0.0  ;;  %v1803_v22 = vmul.f32 %v2148_v21, %v1799_v50 }
 0x476   : > { %1809 = vadd.xlane.f32.xlu1 %v1808_v49 }
 0x477   : > { %v1805_v28 = vsel %vm1250_vm5, %v1803_v22, 0.0 }
 0x478   : > { %1806 = vadd.xlane.f32.xlu0 %v1805_v28 }
 0x4ff   : > { %v1810_v34 = vpop.xlane.xlu1 %1809 }
 0x501   : > { %v1807_v51 = vpop.xlane.xlu0 %1806 }
 0x502   : > { %v1811_v3 = vadd.f32 %v1810_v34, %v1807_v51 }
 0x504   : > { %v1812_v30 = vrot.slane %v1811_v3, 4 }
 0x506   : > { %v1813_v31 = vadd.f32 %v1812_v30, %v1811_v3 }
 0x508   : > { %v1814_v38 = vrot.slane %v1813_v31, 2 }
 0x50a   : > { %v1815_v33 = vadd.f32 %v1814_v38, %v1813_v31 }
 0x50c   : > { %v1816_v60 = vrot.slane %v1815_v33, 1 }
 0x50e   : > { %v1817_v36 = vadd.f32 %v1816_v60, %v1815_v33 }
 0x510   : > { %1819 = vst.msk [vmem:[%s201_s29] sm:$0x1] %vm1818_vm9, %v1817_v36 }
 0x511 PF: > { %p17_p3 = scmp.ge.s32.totalorder %s2357_s20, 4   ;;  %s2964_s15 = smov %s2279_s16 }
 0x512   : > { %s2965_s16 = smov %s2283_s17  ;;  %s2966_s17 = smov %s2367_s23 }
 0x513   : > { %s2967_s18 = smov %s2357_s20  ;;  %19 = sbr.rel (!%p17_p3) target bundleno = 5 (0x5), region = 91 }
 0x518   :  { %1837 = vsyncpa [#allocation6], 1 }
 0x519   :  { %1839 = vsyncpa [#allocation6 + $0x1], 1 }
 0x51a   :  { %1840 = vsyncpa [#allocation8], 1 }
 0x51b   :  { %1842 = vsyncpa [#allocation8 + $0x1], 1 }
 0x51c   :  { %1843 = vsyncmov [#allocation4] }
 0x51f   :  { %s1844_s19 = vpop.sfrf %1843 }
 0x520   :  { %p1970_p5 = scmp.ne.s32.totalorder %s1844_s19, 0 }
 0x522   :  { %1848 = shalt.err (%p1970_p5)  }
 0x523   :  { %1850 = vsyncmov [#allocation4 + $0x1] }
 0x526   :  { %s1851_s5 = vpop.sfrf %1850 }
 0x527   :  { %p1971_p7 = scmp.ne.s32.totalorder %s1851_s5, 0 }
 0x529   :  { %1855 = shalt.err (%p1971_p7)  }

</bundles_post_ra>
